<compile_context>
chip_gen: v6e
topology: v6e:2x2x1
jax: 0.10.0
libtpu: 0.0.40
codegen_flags: <defaults>
</compile_context>

<pallas_src>
import functools

import jax
import jax.numpy as jnp
from jax.experimental import pallas as pl
from jax.experimental.pallas import tpu as pltpu


def _round_up(x, m):
    return (x + m - 1) // m * m


def gru_seq_kernel(x_ref,      # (Tt, Bt, Hp) bf16: embedded inputs, time-major
                   wi_ref,     # (Hp, 3*Hp)  bf16: fused input weights  [W_ir|W_iz|W_in]
                   bi_ref,     # (1, 3*Hp)   f32 : fused biases [b_ir+b_hr | b_iz+b_hz | b_in]
                   wh_ref,     # (Hp, 3*Hp)  bf16: fused hidden weights [W_hr|W_hz|W_hn]
                   bhn_ref,    # (1, Hp)     f32 : remaining hidden bias b_hn
                   out_ref,    # (Bt, Tt, Hp) f32: batch-major per-step hidden outputs
                   gx_scratch, # VMEM (Tt*Bt, 3*Hp) f32: per-block gate pre-activations
                   h_scratch): # VMEM (Bt, Hp) f32: hidden state carried across time blocks
    Tt, Bt, Hp = x_ref.shape

    # New batch block starts -> zero hidden state (time is the inner grid axis).
    @pl.when(pl.program_id(1) == 0)
    def _():
        h_scratch[...] = jnp.zeros_like(h_scratch)

    # Fused input projection for the whole time block: one big MXU matmul
    # (Tt*Bt rows), bf16 in, f32 accumulate, all input-side biases folded in.
    x2 = x_ref[...].reshape(Tt * Bt, Hp)
    gx_scratch[...] = (
        jnp.dot(x2, wi_ref[...], preferred_element_type=jnp.float32)
        + bi_ref[...]
    )

    wh = wh_ref[...]          # resident fused hidden weights (bf16)
    bhn = bhn_ref[...]        # (1, Hp) f32

    h = h_scratch[...]
    for i in range(Tt):       # static unroll; Tt is small (default 8)
        gx = gx_scratch[i * Bt:(i + 1) * Bt, :]          # (Bt, 3Hp) f32, static slice
        # Single fused hidden matmul per step: bf16 in, f32 accumulate.
        ph = jnp.dot(h.astype(wh.dtype), wh,
                     preferred_element_type=jnp.float32)
        # Lane-aligned slices (Hp is a multiple of 128).
        r = jax.nn.sigmoid(gx[:, 0 * Hp:1 * Hp] + ph[:, 0 * Hp:1 * Hp])
        z = jax.nn.sigmoid(gx[:, 1 * Hp:2 * Hp] + ph[:, 1 * Hp:2 * Hp])
        n = jnp.tanh(gx[:, 2 * Hp:3 * Hp] + r * (ph[:, 2 * Hp:3 * Hp] + bhn))
        h = n + z * (h - n)
        # Batch-major store: sublane-indexed but lane-dense (128-wide).
        out_ref[:, i, :] = h.astype(out_ref.dtype)
    h_scratch[...] = h


def gru_forward_pallas(x, w_i, b_i, w_h, b_hn, *, time_block, batch_block):
    """x: (Tp, Bp, Hp) bf16 time-major; weights bf16, biases f32 (padded)."""
    Tp, Bp, Hp = x.shape
    Tt, Bt = time_block, batch_block
    grid = (Bp // Bt, Tp // Tt)

    return pl.pallas_call(
        gru_seq_kernel,
        out_shape=jax.ShapeDtypeStruct((Bp, Tp, Hp), jnp.float32),
        grid_spec=pltpu.PrefetchScalarGridSpec(
            num_scalar_prefetch=0,
            grid=grid,
            in_specs=[
                pl.BlockSpec((Tt, Bt, Hp), lambda b, t: (t, b, 0)),
                # Constant-index weights/biases: single-buffered (no change
                # across grid steps -> no double-buffer VMEM waste).
                pl.BlockSpec((Hp, 3 * Hp), lambda b, t: (0, 0),
                             pipeline_mode=pl.Buffered(1)),
                pl.BlockSpec((1, 3 * Hp), lambda b, t: (0, 0),
                             pipeline_mode=pl.Buffered(1)),
                pl.BlockSpec((Hp, 3 * Hp), lambda b, t: (0, 0),
                             pipeline_mode=pl.Buffered(1)),
                pl.BlockSpec((1, Hp), lambda b, t: (0, 0),
                             pipeline_mode=pl.Buffered(1)),
            ],
            out_specs=pl.BlockSpec((Bt, Tt, Hp), lambda b, t: (b, t, 0)),
            scratch_shapes=[
                pltpu.VMEM((Tt * Bt, 3 * Hp), jnp.float32),   # gate pre-acts
                pltpu.VMEM((Bt, Hp), jnp.float32),            # hidden state
            ],
        ),
        compiler_params=pltpu.CompilerParams(
            # Batch blocks are independent (megacore-shardable on v7x);
            # time carries the recurrence -> sequential.
            dimension_semantics=("parallel", "arbitrary"),
            # 56 MiB fits under v7x's 64 MiB physical VMEM; raise toward
            # ~96-112 MiB on v5e/v6e for large shapes / bigger time blocks.
            vmem_limit_bytes=56 * 1024 * 1024,
        ),
    )(x, w_i, b_i, w_h, b_hn)


def encoder_rnn_forward(tokens, prep, *, time_block=8, batch_block=None):
    """tokens: int32 (B, T). Returns (output (B,T,H) f32, hidden (1,B,H) f32)."""
    B, T = tokens.shape
    H = prep["hidden_size"]
    Hp = prep["w_h"].shape[0]

    Tt = time_block                       # multiple of 8 (out block sublane dim)
    Tp = _round_up(T, Tt)
    Bp0 = _round_up(B, 8)
    Bt = Bp0 if batch_block is None else _round_up(min(batch_block, Bp0), 8)
    Bp = _round_up(Bp0, Bt)

    # Time-major bf16 embedding gather (table already padded to Hp and bf16).
    emb_t = jnp.take(prep["embedding"], tokens.T, axis=0)        # (T, B, Hp)
    # Dropout: eval mode -> identity.

    # Pad batch -> multiple of 8 (sublanes), time -> multiple of the time block.
    x = jnp.zeros((Tp, Bp, Hp), jnp.bfloat16).at[:T, :B, :].set(emb_t)

    out_p = gru_forward_pallas(x, prep["w_i"], prep["b_i"], prep["w_h"],
                               prep["b_hn"], time_block=Tt, batch_block=Bt)

    output = out_p[:B, :T, :H]                     # already batch-major (B,T,H)
    hidden = out_p[:B, T - 1, :H][None, :, :]      # (1, B, H)
    return output, hidden


def prepare_params(params):
    """Fuse per-gate torch-style params into padded, lane-dense matrices."""
    H = params["wir"].shape[0]
    Hp = _round_up(H, 128)
    padw = lambda w: jnp.pad(w, ((0, Hp - H), (0, Hp - H)))
    padb = lambda b: jnp.pad(b, ((0, 0), (0, Hp - H)))
    w_i = jnp.concatenate([padw(params["wir"]), padw(params["wiz"]),
                           padw(params["win"])], axis=1)
    w_h = jnp.concatenate([padw(params["whr"]), padw(params["whz"]),
                           padw(params["whn"])], axis=1)
    # Fold the foldable hidden biases (b_hr, b_hz) into the fused input bias;
    # b_hn must stay separate (it is gated by r inside the tanh).
    b_i = jnp.concatenate([padb(params["b_ir"] + params["b_hr"]),
                           padb(params["b_iz"] + params["b_hz"]),
                           padb(params["b_in"])], axis=1)
    b_hn = padb(params["b_hn"])
    emb = jnp.pad(params["embedding"], ((0, 0), (0, Hp - H)))
    return {
        "hidden_size": H,
        "embedding": emb.astype(jnp.bfloat16),
        "w_i": w_i.astype(jnp.bfloat16),
        "b_i": b_i.astype(jnp.float32),
        "w_h": w_h.astype(jnp.bfloat16),
        "b_hn": b_hn.astype(jnp.float32),
    }


def gru_forward_ref(x_tbh, p):
    """Pure-JAX f32 reference (PyTorch GRU equations) for correctness check."""
    T, B, H = x_tbh.shape

    def step(h, x):
        r = jax.nn.sigmoid(x @ p["wir"] + p["b_ir"] + h @ p["whr"] + p["b_hr"])
        z = jax.nn.sigmoid(x @ p["wiz"] + p["b_iz"] + h @ p["whz"] + p["b_hz"])
        n = jnp.tanh(x @ p["win"] + p["b_in"] + r * (h @ p["whn"] + p["b_hn"]))
        h_new = (1.0 - z) * n + z * h
        return h_new, h_new

    h0 = jnp.zeros((B, H), jnp.float32)
    h_last, outs = jax.lax.scan(step, h0, x_tbh)
    return outs, h_last


def make_params(key, input_size, hidden_size):
    k = 1.0 / jnp.sqrt(jnp.float32(hidden_size))
    keys = jax.random.split(key, 13)
    u = lambda kk, shape: jax.random.uniform(kk, shape, jnp.float32, -k, k)
    return {
        "embedding": jax.random.normal(keys[0], (input_size, hidden_size),
                                       jnp.float32),
        # pre-transposed per-gate weights (torch weight_ih/hh slices, .T)
        "wir": u(keys[1], (hidden_size, hidden_size)),
        "wiz": u(keys[2], (hidden_size, hidden_size)),
        "win": u(keys[3], (hidden_size, hidden_size)),
        "whr": u(keys[4], (hidden_size, hidden_size)),
        "whz": u(keys[5], (hidden_size, hidden_size)),
        "whn": u(keys[6], (hidden_size, hidden_size)),
        "b_ir": u(keys[7], (1, hidden_size)),
        "b_iz": u(keys[8], (1, hidden_size)),
        "b_in": u(keys[9], (1, hidden_size)),
        "b_hr": u(keys[10], (1, hidden_size)),
        "b_hz": u(keys[11], (1, hidden_size)),
        "b_hn": u(keys[12], (1, hidden_size)),
    }


if __name__ == "__main__":
    B, T, H, VOCAB = 2, 8, 32, 20

    key = jax.random.PRNGKey(0)
    pkey, tkey = jax.random.split(key)
    params = make_params(pkey, VOCAB, H)
    prep = prepare_params(params)
    tokens = jax.random.randint(tkey, (B, T), 0, VOCAB, dtype=jnp.int32)

    fwd = jax.jit(functools.partial(encoder_rnn_forward, prep=prep))
    output, hidden = fwd(tokens)
    jax.block_until_ready((output, hidden))

    # Sanity: compare against pure-JAX f32 scan reference (kernel uses bf16
    # embeddings/weights with f32 accumulation, so tolerance is bf16-level).
    emb = jnp.take(params["embedding"], tokens, axis=0)
    x_tbh = jnp.transpose(emb, (1, 0, 2)).astype(jnp.float32)
    out_ref_tbh, h_ref = gru_forward_ref(x_tbh, params)
    out_ref = jnp.transpose(out_ref_tbh, (1, 0, 2))

    assert output.shape == (B, T, H) and hidden.shape == (1, B, H)
    max_err = float(jnp.max(jnp.abs(output - out_ref)))
    assert jnp.allclose(output, out_ref, atol=5e-2, rtol=0.0), max_err
    assert jnp.allclose(hidden[0], h_ref, atol=5e-2, rtol=0.0)

    print("KERNEL_OK")
</pallas_src>

<mosaic_0001>
module attributes {stable_mosaic.version = 11 : i64} {
  func.func @gru_seq_kernel(%arg0: i32, %arg1: i32, %arg2: memref<8x8x128xbf16, #tpu.memory_space<vmem>>, %arg3: memref<128x384xbf16, #tpu.memory_space<vmem>>, %arg4: memref<1x384xf32, #tpu.memory_space<vmem>>, %arg5: memref<128x384xbf16, #tpu.memory_space<vmem>>, %arg6: memref<1x128xf32, #tpu.memory_space<vmem>>, %arg7: memref<8x8x128xf32, #tpu.memory_space<vmem>>, %arg8: memref<64x384xf32, #tpu.memory_space<vmem>>, %arg9: memref<8x128xf32, #tpu.memory_space<vmem>>) attributes {dimension_semantics = [#tpu.dimension_semantics<parallel>, #tpu.dimension_semantics<arbitrary>], iteration_bounds = array<i64: 1, 1>, scalar_prefetch = 0 : i64, scratch_operands = 2 : i64, tpu.core_type = #tpu.core_type<tc>, window_params = [{transform_indices = @transform_0, window_bounds = array<i64: 8, 8, 128>}, {pipeline_mode = #tpu.pipeline_mode<synchronous>, transform_indices = @transform_1, window_bounds = array<i64: 128, 384>}, {pipeline_mode = #tpu.pipeline_mode<synchronous>, transform_indices = @transform_2, window_bounds = array<i64: 1, 384>}, {pipeline_mode = #tpu.pipeline_mode<synchronous>, transform_indices = @transform_3, window_bounds = array<i64: 128, 384>}, {pipeline_mode = #tpu.pipeline_mode<synchronous>, transform_indices = @transform_4, window_bounds = array<i64: 1, 128>}, {transform_indices = @transform_5, window_bounds = array<i64: 8, 8, 128>}]} {
    %c0_i32 = arith.constant 0 : i32
    %0 = arith.cmpi eq, %arg1, %c0_i32 : i32
    %1 = arith.extui %0 : i1 to i32
    %c0_i32_0 = arith.constant 0 : i32
    %2 = arith.cmpi ne, %1, %c0_i32_0 : i32
    scf.if %2 {
      %cst_67 = arith.constant 0.000000e+00 : f32
      %271 = vector.broadcast %cst_67 : f32 to vector<8x128xf32>
      %c0_68 = arith.constant 0 : index
      %c0_69 = arith.constant 0 : index
      %272 = vector.load %arg9[%c0_68, %c0_69] : memref<8x128xf32, #tpu.memory_space<vmem>>, vector<8x128xf32>
      tpu.vector_store %arg9[%c0_68, %c0_69], %271 {strides = array<i32>} : memref<8x128xf32, #tpu.memory_space<vmem>>, vector<8x128xf32>,
    } else {
    }
    %c0 = arith.constant 0 : index
    %c0_1 = arith.constant 0 : index
    %c0_2 = arith.constant 0 : index
    %3 = vector.load %arg2[%c0, %c0_1, %c0_2] : memref<8x8x128xbf16, #tpu.memory_space<vmem>>, vector<8x8x128xbf16>
    %4 = vector.shape_cast %3 : vector<8x8x128xbf16> to vector<64x128xbf16>
    %c0_3 = arith.constant 0 : index
    %c0_4 = arith.constant 0 : index
    %5 = vector.load %arg3[%c0_3, %c0_4] : memref<128x384xbf16, #tpu.memory_space<vmem>>, vector<128x384xbf16>
    %cst = arith.constant dense<0.000000e+00> : vector<64x384xf32>
    %6 = tpu.matmul %4, %5, %cst {dimension_numbers = #tpu.dot_dimension_numbers<[1], [0], [0], [1], [0, 0, 1, 1], [], []>} : vector<64x128xbf16>, vector<128x384xbf16>, vector<64x384xf32> -> vector<64x384xf32>
    %c0_5 = arith.constant 0 : index
    %c0_6 = arith.constant 0 : index
    %7 = vector.load %arg4[%c0_5, %c0_6] : memref<1x384xf32, #tpu.memory_space<vmem>>, vector<1x384xf32>
    %8 = vector.broadcast %7 : vector<1x384xf32> to vector<64x384xf32>
    %9 = arith.addf %6, %8 : vector<64x384xf32>
    %c0_7 = arith.constant 0 : index
    %c0_8 = arith.constant 0 : index
    %10 = vector.load %arg8[%c0_7, %c0_8] : memref<64x384xf32, #tpu.memory_space<vmem>>, vector<64x384xf32>
    tpu.vector_store %arg8[%c0_7, %c0_8], %9 {strides = array<i32>} : memref<64x384xf32, #tpu.memory_space<vmem>>, vector<64x384xf32>,
    %c0_9 = arith.constant 0 : index
    %c0_10 = arith.constant 0 : index
    %11 = vector.load %arg5[%c0_9, %c0_10] : memref<128x384xbf16, #tpu.memory_space<vmem>>, vector<128x384xbf16>
    %c0_11 = arith.constant 0 : index
    %c0_12 = arith.constant 0 : index
    %12 = vector.load %arg6[%c0_11, %c0_12] : memref<1x128xf32, #tpu.memory_space<vmem>>, vector<1x128xf32>
    %c0_13 = arith.constant 0 : index
    %c0_14 = arith.constant 0 : index
    %13 = vector.load %arg9[%c0_13, %c0_14] : memref<8x128xf32, #tpu.memory_space<vmem>>, vector<8x128xf32>
    %c0_15 = arith.constant 0 : index
    %c0_16 = arith.constant 0 : index
    %14 = vector.load %arg8[%c0_15, %c0_16] : memref<64x384xf32, #tpu.memory_space<vmem>>, vector<8x384xf32>
    %15 = arith.truncf %13 : vector<8x128xf32> to vector<8x128xbf16>
    %cst_17 = arith.constant dense<0.000000e+00> : vector<8x384xf32>
    %16 = tpu.matmul %15, %11, %cst_17 {dimension_numbers = #tpu.dot_dimension_numbers<[1], [0], [0], [1], [0, 0, 1, 1], [], []>} : vector<8x128xbf16>, vector<128x384xbf16>, vector<8x384xf32> -> vector<8x384xf32>
    %17 = vector.extract_strided_slice %14 {offsets = [0, 0], sizes = [8, 128], strides = [1, 1]} : vector<8x384xf32> to vector<8x128xf32>
    %18 = vector.extract_strided_slice %16 {offsets = [0, 0], sizes = [8, 128], strides = [1, 1]} : vector<8x384xf32> to vector<8x128xf32>
    %19 = arith.addf %17, %18 : vector<8x128xf32>
    %20 = arith.negf %19 : vector<8x128xf32>
    %21 = math.exp %20 : vector<8x128xf32>
    %cst_18 = arith.constant 1.000000e+00 : f32
    %22 = vector.broadcast %cst_18 : f32 to vector<8x128xf32>
    %23 = arith.addf %22, %21 : vector<8x128xf32>
    %24 = arith.divf %22, %23 : vector<8x128xf32>
    %25 = vector.extract_strided_slice %14 {offsets = [0, 128], sizes = [8, 128], strides = [1, 1]} : vector<8x384xf32> to vector<8x128xf32>
    %26 = vector.extract_strided_slice %16 {offsets = [0, 128], sizes = [8, 128], strides = [1, 1]} : vector<8x384xf32> to vector<8x128xf32>
    %27 = arith.addf %25, %26 : vector<8x128xf32>
    %28 = arith.negf %27 : vector<8x128xf32>
    %29 = math.exp %28 : vector<8x128xf32>
    %cst_19 = arith.constant 1.000000e+00 : f32
    %30 = vector.broadcast %cst_19 : f32 to vector<8x128xf32>
    %31 = arith.addf %30, %29 : vector<8x128xf32>
    %32 = arith.divf %30, %31 : vector<8x128xf32>
    %33 = vector.extract_strided_slice %14 {offsets = [0, 256], sizes = [8, 128], strides = [1, 1]} : vector<8x384xf32> to vector<8x128xf32>
    %34 = vector.extract_strided_slice %16 {offsets = [0, 256], sizes = [8, 128], strides = [1, 1]} : vector<8x384xf32> to vector<8x128xf32>
    %35 = vector.broadcast %12 : vector<1x128xf32> to vector<8x128xf32>
    %36 = arith.addf %34, %35 : vector<8x128xf32>
    %37 = arith.mulf %24, %36 : vector<8x128xf32>
    %38 = arith.addf %33, %37 : vector<8x128xf32>
    %39 = math.tanh %38 : vector<8x128xf32>
    %40 = arith.subf %13, %39 : vector<8x128xf32>
    %41 = arith.mulf %32, %40 : vector<8x128xf32>
    %42 = arith.addf %39, %41 : vector<8x128xf32>
    %c0_20 = arith.constant 0 : index
    %c0_21 = arith.constant 0 : index
    %c0_22 = arith.constant 0 : index
    %43 = vector.load %arg7[%c0_20, %c0_21, %c0_22] : memref<8x8x128xf32, #tpu.memory_space<vmem>>, vector<8x1x128xf32>
    %44 = vector.shape_cast %43 : vector<8x1x128xf32> to vector<8x128xf32>
    %45 = vector.shape_cast %42 : vector<8x128xf32> to vector<8x1x128xf32>
    tpu.vector_store %arg7[%c0_20, %c0_21, %c0_22], %45 {strides = array<i32>} : memref<8x8x128xf32, #tpu.memory_space<vmem>>, vector<8x1x128xf32>,
    %c8 = arith.constant 8 : index
    %c0_23 = arith.constant 0 : index
    %46 = vector.load %arg8[%c8, %c0_23] : memref<64x384xf32, #tpu.memory_space<vmem>>, vector<8x384xf32>
    %47 = arith.truncf %42 : vector<8x128xf32> to vector<8x128xbf16>
    %cst_24 = arith.constant dense<0.000000e+00> : vector<8x384xf32>
    %48 = tpu.matmul %47, %11, %cst_24 {dimension_numbers = #tpu.dot_dimension_numbers<[1], [0], [0], [1], [0, 0, 1, 1], [], []>} : vector<8x128xbf16>, vector<128x384xbf16>, vector<8x384xf32> -> vector<8x384xf32>
    %49 = vector.extract_strided_slice %46 {offsets = [0, 0], sizes = [8, 128], strides = [1, 1]} : vector<8x384xf32> to vector<8x128xf32>
    %50 = vector.extract_strided_slice %48 {offsets = [0, 0], sizes = [8, 128], strides = [1, 1]} : vector<8x384xf32> to vector<8x128xf32>
    %51 = arith.addf %49, %50 : vector<8x128xf32>
    %52 = arith.negf %51 : vector<8x128xf32>
    %53 = math.exp %52 : vector<8x128xf32>
    %cst_25 = arith.constant 1.000000e+00 : f32
    %54 = vector.broadcast %cst_25 : f32 to vector<8x128xf32>
    %55 = arith.addf %54, %53 : vector<8x128xf32>
    %56 = arith.divf %54, %55 : vector<8x128xf32>
    %57 = vector.extract_strided_slice %46 {offsets = [0, 128], sizes = [8, 128], strides = [1, 1]} : vector<8x384xf32> to vector<8x128xf32>
    %58 = vector.extract_strided_slice %48 {offsets = [0, 128], sizes = [8, 128], strides = [1, 1]} : vector<8x384xf32> to vector<8x128xf32>
    %59 = arith.addf %57, %58 : vector<8x128xf32>
    %60 = arith.negf %59 : vector<8x128xf32>
    %61 = math.exp %60 : vector<8x128xf32>
    %cst_26 = arith.constant 1.000000e+00 : f32
    %62 = vector.broadcast %cst_26 : f32 to vector<8x128xf32>
    %63 = arith.addf %62, %61 : vector<8x128xf32>
    %64 = arith.divf %62, %63 : vector<8x128xf32>
    %65 = vector.extract_strided_slice %46 {offsets = [0, 256], sizes = [8, 128], strides = [1, 1]} : vector<8x384xf32> to vector<8x128xf32>
    %66 = vector.extract_strided_slice %48 {offsets = [0, 256], sizes = [8, 128], strides = [1, 1]} : vector<8x384xf32> to vector<8x128xf32>
    %67 = vector.broadcast %12 : vector<1x128xf32> to vector<8x128xf32>
    %68 = arith.addf %66, %67 : vector<8x128xf32>
    %69 = arith.mulf %56, %68 : vector<8x128xf32>
    %70 = arith.addf %65, %69 : vector<8x128xf32>
    %71 = math.tanh %70 : vector<8x128xf32>
    %72 = arith.subf %42, %71 : vector<8x128xf32>
    %73 = arith.mulf %64, %72 : vector<8x128xf32>
    %74 = arith.addf %71, %73 : vector<8x128xf32>
    %c0_27 = arith.constant 0 : index
    %c1 = arith.constant 1 : index
    %c0_28 = arith.constant 0 : index
    %75 = vector.load %arg7[%c0_27, %c1, %c0_28] : memref<8x8x128xf32, #tpu.memory_space<vmem>>, vector<8x1x128xf32>
    %76 = vector.shape_cast %75 : vector<8x1x128xf32> to vector<8x128xf32>
    %77 = vector.shape_cast %74 : vector<8x128xf32> to vector<8x1x128xf32>
    tpu.vector_store %arg7[%c0_27, %c1, %c0_28], %77 {strides = array<i32>} : memref<8x8x128xf32, #tpu.memory_space<vmem>>, vector<8x1x128xf32>,
    %c16 = arith.constant 16 : index
    %c0_29 = arith.constant 0 : index
    %78 = vector.load %arg8[%c16, %c0_29] : memref<64x384xf32, #tpu.memory_space<vmem>>, vector<8x384xf32>
    %79 = arith.truncf %74 : vector<8x128xf32> to vector<8x128xbf16>
    %cst_30 = arith.constant dense<0.000000e+00> : vector<8x384xf32>
    %80 = tpu.matmul %79, %11, %cst_30 {dimension_numbers = #tpu.dot_dimension_numbers<[1], [0], [0], [1], [0, 0, 1, 1], [], []>} : vector<8x128xbf16>, vector<128x384xbf16>, vector<8x384xf32> -> vector<8x384xf32>
    %81 = vector.extract_strided_slice %78 {offsets = [0, 0], sizes = [8, 128], strides = [1, 1]} : vector<8x384xf32> to vector<8x128xf32>
    %82 = vector.extract_strided_slice %80 {offsets = [0, 0], sizes = [8, 128], strides = [1, 1]} : vector<8x384xf32> to vector<8x128xf32>
    %83 = arith.addf %81, %82 : vector<8x128xf32>
    %84 = arith.negf %83 : vector<8x128xf32>
    %85 = math.exp %84 : vector<8x128xf32>
    %cst_31 = arith.constant 1.000000e+00 : f32
    %86 = vector.broadcast %cst_31 : f32 to vector<8x128xf32>
    %87 = arith.addf %86, %85 : vector<8x128xf32>
    %88 = arith.divf %86, %87 : vector<8x128xf32>
    %89 = vector.extract_strided_slice %78 {offsets = [0, 128], sizes = [8, 128], strides = [1, 1]} : vector<8x384xf32> to vector<8x128xf32>
    %90 = vector.extract_strided_slice %80 {offsets = [0, 128], sizes = [8, 128], strides = [1, 1]} : vector<8x384xf32> to vector<8x128xf32>
    %91 = arith.addf %89, %90 : vector<8x128xf32>
    %92 = arith.negf %91 : vector<8x128xf32>
    %93 = math.exp %92 : vector<8x128xf32>
    %cst_32 = arith.constant 1.000000e+00 : f32
    %94 = vector.broadcast %cst_32 : f32 to vector<8x128xf32>
    %95 = arith.addf %94, %93 : vector<8x128xf32>
    %96 = arith.divf %94, %95 : vector<8x128xf32>
    %97 = vector.extract_strided_slice %78 {offsets = [0, 256], sizes = [8, 128], strides = [1, 1]} : vector<8x384xf32> to vector<8x128xf32>
    %98 = vector.extract_strided_slice %80 {offsets = [0, 256], sizes = [8, 128], strides = [1, 1]} : vector<8x384xf32> to vector<8x128xf32>
    %99 = vector.broadcast %12 : vector<1x128xf32> to vector<8x128xf32>
    %100 = arith.addf %98, %99 : vector<8x128xf32>
    %101 = arith.mulf %88, %100 : vector<8x128xf32>
    %102 = arith.addf %97, %101 : vector<8x128xf32>
    %103 = math.tanh %102 : vector<8x128xf32>
    %104 = arith.subf %74, %103 : vector<8x128xf32>
    %105 = arith.mulf %96, %104 : vector<8x128xf32>
    %106 = arith.addf %103, %105 : vector<8x128xf32>
    %c0_33 = arith.constant 0 : index
    %c2 = arith.constant 2 : index
    %c0_34 = arith.constant 0 : index
    %107 = vector.load %arg7[%c0_33, %c2, %c0_34] : memref<8x8x128xf32, #tpu.memory_space<vmem>>, vector<8x1x128xf32>
    %108 = vector.shape_cast %107 : vector<8x1x128xf32> to vector<8x128xf32>
    %109 = vector.shape_cast %106 : vector<8x128xf32> to vector<8x1x128xf32>
    tpu.vector_store %arg7[%c0_33, %c2, %c0_34], %109 {strides = array<i32>} : memref<8x8x128xf32, #tpu.memory_space<vmem>>, vector<8x1x128xf32>,
    %c24 = arith.constant 24 : index
    %c0_35 = arith.constant 0 : index
    %110 = vector.load %arg8[%c24, %c0_35] : memref<64x384xf32, #tpu.memory_space<vmem>>, vector<8x384xf32>
    %111 = arith.truncf %106 : vector<8x128xf32> to vector<8x128xbf16>
    %cst_36 = arith.constant dense<0.000000e+00> : vector<8x384xf32>
    %112 = tpu.matmul %111, %11, %cst_36 {dimension_numbers = #tpu.dot_dimension_numbers<[1], [0], [0], [1], [0, 0, 1, 1], [], []>} : vector<8x128xbf16>, vector<128x384xbf16>, vector<8x384xf32> -> vector<8x384xf32>
    %113 = vector.extract_strided_slice %110 {offsets = [0, 0], sizes = [8, 128], strides = [1, 1]} : vector<8x384xf32> to vector<8x128xf32>
    %114 = vector.extract_strided_slice %112 {offsets = [0, 0], sizes = [8, 128], strides = [1, 1]} : vector<8x384xf32> to vector<8x128xf32>
    %115 = arith.addf %113, %114 : vector<8x128xf32>
    %116 = arith.negf %115 : vector<8x128xf32>
    %117 = math.exp %116 : vector<8x128xf32>
    %cst_37 = arith.constant 1.000000e+00 : f32
    %118 = vector.broadcast %cst_37 : f32 to vector<8x128xf32>
    %119 = arith.addf %118, %117 : vector<8x128xf32>
    %120 = arith.divf %118, %119 : vector<8x128xf32>
    %121 = vector.extract_strided_slice %110 {offsets = [0, 128], sizes = [8, 128], strides = [1, 1]} : vector<8x384xf32> to vector<8x128xf32>
    %122 = vector.extract_strided_slice %112 {offsets = [0, 128], sizes = [8, 128], strides = [1, 1]} : vector<8x384xf32> to vector<8x128xf32>
    %123 = arith.addf %121, %122 : vector<8x128xf32>
    %124 = arith.negf %123 : vector<8x128xf32>
    %125 = math.exp %124 : vector<8x128xf32>
    %cst_38 = arith.constant 1.000000e+00 : f32
    %126 = vector.broadcast %cst_38 : f32 to vector<8x128xf32>
    %127 = arith.addf %126, %125 : vector<8x128xf32>
    %128 = arith.divf %126, %127 : vector<8x128xf32>
    %129 = vector.extract_strided_slice %110 {offsets = [0, 256], sizes = [8, 128], strides = [1, 1]} : vector<8x384xf32> to vector<8x128xf32>
    %130 = vector.extract_strided_slice %112 {offsets = [0, 256], sizes = [8, 128], strides = [1, 1]} : vector<8x384xf32> to vector<8x128xf32>
    %131 = vector.broadcast %12 : vector<1x128xf32> to vector<8x128xf32>
    %132 = arith.addf %130, %131 : vector<8x128xf32>
    %133 = arith.mulf %120, %132 : vector<8x128xf32>
    %134 = arith.addf %129, %133 : vector<8x128xf32>
    %135 = math.tanh %134 : vector<8x128xf32>
    %136 = arith.subf %106, %135 : vector<8x128xf32>
    %137 = arith.mulf %128, %136 : vector<8x128xf32>
    %138 = arith.addf %135, %137 : vector<8x128xf32>
    %c0_39 = arith.constant 0 : index
    %c3 = arith.constant 3 : index
    %c0_40 = arith.constant 0 : index
    %139 = vector.load %arg7[%c0_39, %c3, %c0_40] : memref<8x8x128xf32, #tpu.memory_space<vmem>>, vector<8x1x128xf32>
    %140 = vector.shape_cast %139 : vector<8x1x128xf32> to vector<8x128xf32>
    %141 = vector.shape_cast %138 : vector<8x128xf32> to vector<8x1x128xf32>
    tpu.vector_store %arg7[%c0_39, %c3, %c0_40], %141 {strides = array<i32>} : memref<8x8x128xf32, #tpu.memory_space<vmem>>, vector<8x1x128xf32>,
    %c32 = arith.constant 32 : index
    %c0_41 = arith.constant 0 : index
    %142 = vector.load %arg8[%c32, %c0_41] : memref<64x384xf32, #tpu.memory_space<vmem>>, vector<8x384xf32>
    %143 = arith.truncf %138 : vector<8x128xf32> to vector<8x128xbf16>
    %cst_42 = arith.constant dense<0.000000e+00> : vector<8x384xf32>
    %144 = tpu.matmul %143, %11, %cst_42 {dimension_numbers = #tpu.dot_dimension_numbers<[1], [0], [0], [1], [0, 0, 1, 1], [], []>} : vector<8x128xbf16>, vector<128x384xbf16>, vector<8x384xf32> -> vector<8x384xf32>
    %145 = vector.extract_strided_slice %142 {offsets = [0, 0], sizes = [8, 128], strides = [1, 1]} : vector<8x384xf32> to vector<8x128xf32>
    %146 = vector.extract_strided_slice %144 {offsets = [0, 0], sizes = [8, 128], strides = [1, 1]} : vector<8x384xf32> to vector<8x128xf32>
    %147 = arith.addf %145, %146 : vector<8x128xf32>
    %148 = arith.negf %147 : vector<8x128xf32>
    %149 = math.exp %148 : vector<8x128xf32>
    %cst_43 = arith.constant 1.000000e+00 : f32
    %150 = vector.broadcast %cst_43 : f32 to vector<8x128xf32>
    %151 = arith.addf %150, %149 : vector<8x128xf32>
    %152 = arith.divf %150, %151 : vector<8x128xf32>
    %153 = vector.extract_strided_slice %142 {offsets = [0, 128], sizes = [8, 128], strides = [1, 1]} : vector<8x384xf32> to vector<8x128xf32>
    %154 = vector.extract_strided_slice %144 {offsets = [0, 128], sizes = [8, 128], strides = [1, 1]} : vector<8x384xf32> to vector<8x128xf32>
    %155 = arith.addf %153, %154 : vector<8x128xf32>
    %156 = arith.negf %155 : vector<8x128xf32>
    %157 = math.exp %156 : vector<8x128xf32>
    %cst_44 = arith.constant 1.000000e+00 : f32
    %158 = vector.broadcast %cst_44 : f32 to vector<8x128xf32>
    %159 = arith.addf %158, %157 : vector<8x128xf32>
    %160 = arith.divf %158, %159 : vector<8x128xf32>
    %161 = vector.extract_strided_slice %142 {offsets = [0, 256], sizes = [8, 128], strides = [1, 1]} : vector<8x384xf32> to vector<8x128xf32>
    %162 = vector.extract_strided_slice %144 {offsets = [0, 256], sizes = [8, 128], strides = [1, 1]} : vector<8x384xf32> to vector<8x128xf32>
    %163 = vector.broadcast %12 : vector<1x128xf32> to vector<8x128xf32>
    %164 = arith.addf %162, %163 : vector<8x128xf32>
    %165 = arith.mulf %152, %164 : vector<8x128xf32>
    %166 = arith.addf %161, %165 : vector<8x128xf32>
    %167 = math.tanh %166 : vector<8x128xf32>
    %168 = arith.subf %138, %167 : vector<8x128xf32>
    %169 = arith.mulf %160, %168 : vector<8x128xf32>
    %170 = arith.addf %167, %169 : vector<8x128xf32>
    %c0_45 = arith.constant 0 : index
    %c4 = arith.constant 4 : index
    %c0_46 = arith.constant 0 : index
    %171 = vector.load %arg7[%c0_45, %c4, %c0_46] : memref<8x8x128xf32, #tpu.memory_space<vmem>>, vector<8x1x128xf32>
    %172 = vector.shape_cast %171 : vector<8x1x128xf32> to vector<8x128xf32>
    %173 = vector.shape_cast %170 : vector<8x128xf32> to vector<8x1x128xf32>
    tpu.vector_store %arg7[%c0_45, %c4, %c0_46], %173 {strides = array<i32>} : memref<8x8x128xf32, #tpu.memory_space<vmem>>, vector<8x1x128xf32>,
    %c40 = arith.constant 40 : index
    %c0_47 = arith.constant 0 : index
    %174 = vector.load %arg8[%c40, %c0_47] : memref<64x384xf32, #tpu.memory_space<vmem>>, vector<8x384xf32>
    %175 = arith.truncf %170 : vector<8x128xf32> to vector<8x128xbf16>
    %cst_48 = arith.constant dense<0.000000e+00> : vector<8x384xf32>
    %176 = tpu.matmul %175, %11, %cst_48 {dimension_numbers = #tpu.dot_dimension_numbers<[1], [0], [0], [1], [0, 0, 1, 1], [], []>} : vector<8x128xbf16>, vector<128x384xbf16>, vector<8x384xf32> -> vector<8x384xf32>
    %177 = vector.extract_strided_slice %174 {offsets = [0, 0], sizes = [8, 128], strides = [1, 1]} : vector<8x384xf32> to vector<8x128xf32>
    %178 = vector.extract_strided_slice %176 {offsets = [0, 0], sizes = [8, 128], strides = [1, 1]} : vector<8x384xf32> to vector<8x128xf32>
    %179 = arith.addf %177, %178 : vector<8x128xf32>
    %180 = arith.negf %179 : vector<8x128xf32>
    %181 = math.exp %180 : vector<8x128xf32>
    %cst_49 = arith.constant 1.000000e+00 : f32
    %182 = vector.broadcast %cst_49 : f32 to vector<8x128xf32>
    %183 = arith.addf %182, %181 : vector<8x128xf32>
    %184 = arith.divf %182, %183 : vector<8x128xf32>
    %185 = vector.extract_strided_slice %174 {offsets = [0, 128], sizes = [8, 128], strides = [1, 1]} : vector<8x384xf32> to vector<8x128xf32>
    %186 = vector.extract_strided_slice %176 {offsets = [0, 128], sizes = [8, 128], strides = [1, 1]} : vector<8x384xf32> to vector<8x128xf32>
    %187 = arith.addf %185, %186 : vector<8x128xf32>
    %188 = arith.negf %187 : vector<8x128xf32>
    %189 = math.exp %188 : vector<8x128xf32>
    %cst_50 = arith.constant 1.000000e+00 : f32
    %190 = vector.broadcast %cst_50 : f32 to vector<8x128xf32>
    %191 = arith.addf %190, %189 : vector<8x128xf32>
    %192 = arith.divf %190, %191 : vector<8x128xf32>
    %193 = vector.extract_strided_slice %174 {offsets = [0, 256], sizes = [8, 128], strides = [1, 1]} : vector<8x384xf32> to vector<8x128xf32>
    %194 = vector.extract_strided_slice %176 {offsets = [0, 256], sizes = [8, 128], strides = [1, 1]} : vector<8x384xf32> to vector<8x128xf32>
    %195 = vector.broadcast %12 : vector<1x128xf32> to vector<8x128xf32>
    %196 = arith.addf %194, %195 : vector<8x128xf32>
    %197 = arith.mulf %184, %196 : vector<8x128xf32>
    %198 = arith.addf %193, %197 : vector<8x128xf32>
    %199 = math.tanh %198 : vector<8x128xf32>
    %200 = arith.subf %170, %199 : vector<8x128xf32>
    %201 = arith.mulf %192, %200 : vector<8x128xf32>
    %202 = arith.addf %199, %201 : vector<8x128xf32>
    %c0_51 = arith.constant 0 : index
    %c5 = arith.constant 5 : index
    %c0_52 = arith.constant 0 : index
    %203 = vector.load %arg7[%c0_51, %c5, %c0_52] : memref<8x8x128xf32, #tpu.memory_space<vmem>>, vector<8x1x128xf32>
    %204 = vector.shape_cast %203 : vector<8x1x128xf32> to vector<8x128xf32>
    %205 = vector.shape_cast %202 : vector<8x128xf32> to vector<8x1x128xf32>
    tpu.vector_store %arg7[%c0_51, %c5, %c0_52], %205 {strides = array<i32>} : memref<8x8x128xf32, #tpu.memory_space<vmem>>, vector<8x1x128xf32>,
    %c48 = arith.constant 48 : index
    %c0_53 = arith.constant 0 : index
    %206 = vector.load %arg8[%c48, %c0_53] : memref<64x384xf32, #tpu.memory_space<vmem>>, vector<8x384xf32>
    %207 = arith.truncf %202 : vector<8x128xf32> to vector<8x128xbf16>
    %cst_54 = arith.constant dense<0.000000e+00> : vector<8x384xf32>
    %208 = tpu.matmul %207, %11, %cst_54 {dimension_numbers = #tpu.dot_dimension_numbers<[1], [0], [0], [1], [0, 0, 1, 1], [], []>} : vector<8x128xbf16>, vector<128x384xbf16>, vector<8x384xf32> -> vector<8x384xf32>
    %209 = vector.extract_strided_slice %206 {offsets = [0, 0], sizes = [8, 128], strides = [1, 1]} : vector<8x384xf32> to vector<8x128xf32>
    %210 = vector.extract_strided_slice %208 {offsets = [0, 0], sizes = [8, 128], strides = [1, 1]} : vector<8x384xf32> to vector<8x128xf32>
    %211 = arith.addf %209, %210 : vector<8x128xf32>
    %212 = arith.negf %211 : vector<8x128xf32>
    %213 = math.exp %212 : vector<8x128xf32>
    %cst_55 = arith.constant 1.000000e+00 : f32
    %214 = vector.broadcast %cst_55 : f32 to vector<8x128xf32>
    %215 = arith.addf %214, %213 : vector<8x128xf32>
    %216 = arith.divf %214, %215 : vector<8x128xf32>
    %217 = vector.extract_strided_slice %206 {offsets = [0, 128], sizes = [8, 128], strides = [1, 1]} : vector<8x384xf32> to vector<8x128xf32>
    %218 = vector.extract_strided_slice %208 {offsets = [0, 128], sizes = [8, 128], strides = [1, 1]} : vector<8x384xf32> to vector<8x128xf32>
    %219 = arith.addf %217, %218 : vector<8x128xf32>
    %220 = arith.negf %219 : vector<8x128xf32>
    %221 = math.exp %220 : vector<8x128xf32>
    %cst_56 = arith.constant 1.000000e+00 : f32
    %222 = vector.broadcast %cst_56 : f32 to vector<8x128xf32>
    %223 = arith.addf %222, %221 : vector<8x128xf32>
    %224 = arith.divf %222, %223 : vector<8x128xf32>
    %225 = vector.extract_strided_slice %206 {offsets = [0, 256], sizes = [8, 128], strides = [1, 1]} : vector<8x384xf32> to vector<8x128xf32>
    %226 = vector.extract_strided_slice %208 {offsets = [0, 256], sizes = [8, 128], strides = [1, 1]} : vector<8x384xf32> to vector<8x128xf32>
    %227 = vector.broadcast %12 : vector<1x128xf32> to vector<8x128xf32>
    %228 = arith.addf %226, %227 : vector<8x128xf32>
    %229 = arith.mulf %216, %228 : vector<8x128xf32>
    %230 = arith.addf %225, %229 : vector<8x128xf32>
    %231 = math.tanh %230 : vector<8x128xf32>
    %232 = arith.subf %202, %231 : vector<8x128xf32>
    %233 = arith.mulf %224, %232 : vector<8x128xf32>
    %234 = arith.addf %231, %233 : vector<8x128xf32>
    %c0_57 = arith.constant 0 : index
    %c6 = arith.constant 6 : index
    %c0_58 = arith.constant 0 : index
    %235 = vector.load %arg7[%c0_57, %c6, %c0_58] : memref<8x8x128xf32, #tpu.memory_space<vmem>>, vector<8x1x128xf32>
    %236 = vector.shape_cast %235 : vector<8x1x128xf32> to vector<8x128xf32>
    %237 = vector.shape_cast %234 : vector<8x128xf32> to vector<8x1x128xf32>
    tpu.vector_store %arg7[%c0_57, %c6, %c0_58], %237 {strides = array<i32>} : memref<8x8x128xf32, #tpu.memory_space<vmem>>, vector<8x1x128xf32>,
    %c56 = arith.constant 56 : index
    %c0_59 = arith.constant 0 : index
    %238 = vector.load %arg8[%c56, %c0_59] : memref<64x384xf32, #tpu.memory_space<vmem>>, vector<8x384xf32>
    %239 = arith.truncf %234 : vector<8x128xf32> to vector<8x128xbf16>
    %cst_60 = arith.constant dense<0.000000e+00> : vector<8x384xf32>
    %240 = tpu.matmul %239, %11, %cst_60 {dimension_numbers = #tpu.dot_dimension_numbers<[1], [0], [0], [1], [0, 0, 1, 1], [], []>} : vector<8x128xbf16>, vector<128x384xbf16>, vector<8x384xf32> -> vector<8x384xf32>
    %241 = vector.extract_strided_slice %238 {offsets = [0, 0], sizes = [8, 128], strides = [1, 1]} : vector<8x384xf32> to vector<8x128xf32>
    %242 = vector.extract_strided_slice %240 {offsets = [0, 0], sizes = [8, 128], strides = [1, 1]} : vector<8x384xf32> to vector<8x128xf32>
    %243 = arith.addf %241, %242 : vector<8x128xf32>
    %244 = arith.negf %243 : vector<8x128xf32>
    %245 = math.exp %244 : vector<8x128xf32>
    %cst_61 = arith.constant 1.000000e+00 : f32
    %246 = vector.broadcast %cst_61 : f32 to vector<8x128xf32>
    %247 = arith.addf %246, %245 : vector<8x128xf32>
    %248 = arith.divf %246, %247 : vector<8x128xf32>
    %249 = vector.extract_strided_slice %238 {offsets = [0, 128], sizes = [8, 128], strides = [1, 1]} : vector<8x384xf32> to vector<8x128xf32>
    %250 = vector.extract_strided_slice %240 {offsets = [0, 128], sizes = [8, 128], strides = [1, 1]} : vector<8x384xf32> to vector<8x128xf32>
    %251 = arith.addf %249, %250 : vector<8x128xf32>
    %252 = arith.negf %251 : vector<8x128xf32>
    %253 = math.exp %252 : vector<8x128xf32>
    %cst_62 = arith.constant 1.000000e+00 : f32
    %254 = vector.broadcast %cst_62 : f32 to vector<8x128xf32>
    %255 = arith.addf %254, %253 : vector<8x128xf32>
    %256 = arith.divf %254, %255 : vector<8x128xf32>
    %257 = vector.extract_strided_slice %238 {offsets = [0, 256], sizes = [8, 128], strides = [1, 1]} : vector<8x384xf32> to vector<8x128xf32>
    %258 = vector.extract_strided_slice %240 {offsets = [0, 256], sizes = [8, 128], strides = [1, 1]} : vector<8x384xf32> to vector<8x128xf32>
    %259 = vector.broadcast %12 : vector<1x128xf32> to vector<8x128xf32>
    %260 = arith.addf %258, %259 : vector<8x128xf32>
    %261 = arith.mulf %248, %260 : vector<8x128xf32>
    %262 = arith.addf %257, %261 : vector<8x128xf32>
    %263 = math.tanh %262 : vector<8x128xf32>
    %264 = arith.subf %234, %263 : vector<8x128xf32>
    %265 = arith.mulf %256, %264 : vector<8x128xf32>
    %266 = arith.addf %263, %265 : vector<8x128xf32>
    %c0_63 = arith.constant 0 : index
    %c7 = arith.constant 7 : index
    %c0_64 = arith.constant 0 : index
    %267 = vector.load %arg7[%c0_63, %c7, %c0_64] : memref<8x8x128xf32, #tpu.memory_space<vmem>>, vector<8x1x128xf32>
    %268 = vector.shape_cast %267 : vector<8x1x128xf32> to vector<8x128xf32>
    %269 = vector.shape_cast %266 : vector<8x128xf32> to vector<8x1x128xf32>
    tpu.vector_store %arg7[%c0_63, %c7, %c0_64], %269 {strides = array<i32>} : memref<8x8x128xf32, #tpu.memory_space<vmem>>, vector<8x1x128xf32>,
    %c0_65 = arith.constant 0 : index
    %c0_66 = arith.constant 0 : index
    %270 = vector.load %arg9[%c0_65, %c0_66] : memref<8x128xf32, #tpu.memory_space<vmem>>, vector<8x128xf32>
    tpu.vector_store %arg9[%c0_65, %c0_66], %266 {strides = array<i32>} : memref<8x128xf32, #tpu.memory_space<vmem>>, vector<8x128xf32>,
    return
  }
  func.func @transform_0(%arg0: i32, %arg1: i32) -> (i32, i32, i32) {
    %c0_i32 = arith.constant 0 : i32
    %c0_i32_0 = arith.constant 0 : i32
    return %arg1, %arg0, %c0_i32 : i32, i32, i32
  }
  func.func @transform_1(%arg0: i32, %arg1: i32) -> (i32, i32) {
    %c0_i32 = arith.constant 0 : i32
    %c0_i32_0 = arith.constant 0 : i32
    %c0_i32_1 = arith.constant 0 : i32
    return %c0_i32, %c0_i32_0 : i32, i32
  }
  func.func @transform_2(%arg0: i32, %arg1: i32) -> (i32, i32) {
    %c0_i32 = arith.constant 0 : i32
    %c0_i32_0 = arith.constant 0 : i32
    %c0_i32_1 = arith.constant 0 : i32
    return %c0_i32, %c0_i32_0 : i32, i32
  }
  func.func @transform_3(%arg0: i32, %arg1: i32) -> (i32, i32) {
    %c0_i32 = arith.constant 0 : i32
    %c0_i32_0 = arith.constant 0 : i32
    %c0_i32_1 = arith.constant 0 : i32
    return %c0_i32, %c0_i32_0 : i32, i32
  }
  func.func @transform_4(%arg0: i32, %arg1: i32) -> (i32, i32) {
    %c0_i32 = arith.constant 0 : i32
    %c0_i32_0 = arith.constant 0 : i32
    %c0_i32_1 = arith.constant 0 : i32
    return %c0_i32, %c0_i32_0 : i32, i32
  }
  func.func @transform_5(%arg0: i32, %arg1: i32) -> (i32, i32, i32) {
    %c0_i32 = arith.constant 0 : i32
    %c0_i32_0 = arith.constant 0 : i32
    return %arg0, %arg1, %c0_i32 : i32, i32, i32
  }
}

</mosaic_0001>

<bundles_post_ra>
// kernel: encoder_rnn_forward.1
= control target key start
LH: loop header
LB: loop body
LE: loop exit
PB: predicated region body
PF: predicated region fallthrough
CT: control target
= control target key end

     0   :  { %10 = vsyncpa [#allocation5], 0  ;;  %s3394_s0 = inlined_call_operand.vmem [shape: bf16[8,8,128], index: 0, kind: input, shape index: {}]   ;;  %s3395_s1 = inlined_call_operand.hbm [shape: bf16[128,384], index: 1, kind: input, shape index: {}]   ;;  %s3396_s2 = inlined_call_operand.vmem [shape: f32[1,384], index: 2, kind: input, shape index: {}]   ;;  %s3397_s3 = inlined_call_operand.hbm [shape: bf16[128,384], index: 3, kind: input, shape index: {}]   ;;  %s3398_s4 = inlined_call_operand.vmem [shape: f32[1,128], index: 4, kind: input, shape index: {}]   ;;  %s3399_s5 = inlined_call_operand.vmem [shape: f32[8,8,128], index: 5, kind: output, shape index: {}]  }
   0x1   :  { %11 = vsyncpa [#allocation7], 0  ;;  %s2571_s18 = smov [#allocation4]  }
   0x2   :  { %s19_s19 = sshll.u32 %s2571_s18, 4  ;;  %s20_s19 = int_to_ptr.vmem [resolvable:$true] %s19_s19 }
   0x3   :  { %s2535_s20 = scalar_lea.vmem %s20_s19, 3072  ;;  %p2540_p1 = scmp.lt.s32.totalorder %s20_s19, %s20_s19 }
   0x4   :  { %p2536_p0 = scmp.ne.s32.totalorder %s20_s19, %s2535_s20  ;;  %p2541_p2 = scmp.lt.s32.totalorder %s2535_s20, %s2535_s20 }
   0x6   :  { %p2542_p3 = por %p2541_p2, %p2540_p1 }
   0x8   :  { %p2543_p4 = pnand %p2542_p3, %p2536_p0 }
   0xa   :  { %2546 = shalt.err (!%p2543_p4)
}
   0xb   :  { %s2572_s21 = smov 192   ;;  %s2573_s22 = smov 12  }
   0xc   :  { %25 = dma.hbm_to_vmem [thread:$0]  %s3395_s1, 3072, %s20_s19, [#allocation5], %s2572_s21, %s2572_s21, %s2573_s22  }
   0xd   :  { %s2574_s25 = smov [#allocation6]  }
   0xe   :  { %s33_s26 = sshll.u32 %s2574_s25, 4  ;;  %s34_s26 = int_to_ptr.vmem [resolvable:$true] %s33_s26 }
   0xf   :  { %s2555_s27 = scalar_lea.vmem %s34_s26, 3072  ;;  %p2560_p6 = scmp.lt.s32.totalorder %s34_s26, %s34_s26 }
  0x10   :  { %p2556_p5 = scmp.ne.s32.totalorder %s34_s26, %s2555_s27  ;;  %p2561_p7 = scmp.lt.s32.totalorder %s2555_s27, %s2555_s27 }
  0x12   :  { %p2562_p8 = por %p2561_p7, %p2560_p6 }
  0x14   :  { %p2563_p9 = pnand %p2562_p8, %p2556_p5 }
  0x16   :  { %2566 = shalt.err (!%p2563_p9)
}
  0x17   :  { %39 = dma.hbm_to_vmem [thread:$0]  %s3397_s3, 3072, %s34_s26, [#allocation7], %s2572_s21, %s2572_s21, %s2573_s22  }
  0x18   :  { %2567 = dma.done.wait [#allocation5], 3072  }
  0x19   :  { %2568 = vsyncadd [#allocation5], 4294964224 }
  0x1a   :  { %2569 = dma.done.wait [#allocation7], 3072  }
  0x1b   :  { %2570 = vsyncadd [#allocation7], 4294964224  ;;  %v3400_v0 = vmov 0   ;;  %v2354_v1 = vld [vmem:[#allocation4 + $0xac] ss:$12 sps:$4 sm:$0xff]   ;;  %v2380_v12 = vld [vmem:[%s3394_s0] sm:$0xff]   ;;  %v96_v55 = vlaneseq }
  0x1c   :  { %295 = vmatprep.mubr.bf16.mxu0 %v3400_v0  ;;  %v2356_v2 = vld [vmem:[#allocation4 + $0xa8] ss:$12 sps:$4 sm:$0xff]   ;;  %263 = vmatprep.subr.bf16.mxu0 %v2354_v1  ;;  %v2359_v4 = vld [vmem:[#allocation4 + $0x90] ss:$12 sps:$4 sm:$0xff]   ;;  %v2362_v6 = vld [vmem:[#allocation4 + $0x78] ss:$12 sps:$4 sm:$0xff]  }
  0x1d   :  { %v2357_v3 = vld [vmem:[#allocation4 + $0x94] ss:$12 sps:$4 sm:$0xff]   ;;  %264 = vmatpush1.bf16.msra.mxu0 %v2356_v2  ;;  %v2360_v5 = vld [vmem:[#allocation4 + $0x7c] ss:$12 sps:$4 sm:$0xff]   ;;  %v2363_v7 = vld [vmem:[#allocation4 + $0x64] ss:$12 sps:$4 sm:$0xff]   ;;  %2177 = vmatprep.mubr.bf16.mxu1 %v2380_v12 }
  0x1e   :  { %265 = vmatprep.subr.bf16.mxu0 %v2357_v3  ;;  %v2375_v8 = vld [vmem:[#allocation4 + $0xb0] ss:$12 sps:$4 sm:$0xff]   ;;  %v2365_v9 = vld [vmem:[#allocation4 + $0x60] ss:$12 sps:$4 sm:$0xff]   ;;  %v2379_v11 = vld [vmem:[#allocation4 + $0x98] ss:$12 sps:$4 sm:$0xff]  }
  0x1f   :  { %v2366_v10 = vld [vmem:[#allocation4 + $0x4c] ss:$12 sps:$4 sm:$0xff]   ;;  %2161 = vmatprep.subr.bf16.mxu1 %v2375_v8  ;;  %v2368_v13 = vld [vmem:[#allocation4 + $0x48] ss:$12 sps:$4 sm:$0xff]   ;;  %v2371_v17 = vld [vmem:[#allocation4 + $0x30] ss:$12 sps:$4 sm:$0xff]  }
  0x20   :  { %2162 = vmatpush3.bf16.msra.mxu1 %v2375_v8  ;;  %v2384_v14 = vld [vmem:[#allocation4 + $0x80] ss:$12 sps:$4 sm:$0xff]   ;;  %v2388_v16 = vld [vmem:[#allocation4 + $0x68] ss:$12 sps:$4 sm:$0xff]   ;;  %v2393_v19 = vld [vmem:[#allocation4 + $0x50] ss:$12 sps:$4 sm:$0xff]  }
  0x21   :  { %266 = vmatpush1.bf16.msra.mxu0 %v2359_v4  ;;  %2163 = vmatprep.subr.bf16.mxu1 %v2379_v11  ;;  %v2369_v15 = vld [vmem:[#allocation4 + $0x34] ss:$12 sps:$4 sm:$0xff]   ;;  %v2372_v18 = vld [vmem:[#allocation4 + $0x1c] ss:$12 sps:$4 sm:$0xff]   ;;  %v2374_v20 = vld [vmem:[#allocation4 + $0x18] ss:$12 sps:$4 sm:$0xff]  }
  0x22   :  { %267 = vmatprep.subr.bf16.mxu0 %v2360_v5  ;;  %v2376_v21 = vld [vmem:[#allocation4 + $0x4] ss:$12 sps:$4 sm:$0xff]   ;;  %v2378_v23 = vld [vmem:[#allocation4] ss:$12 sps:$4 sm:$0xff]   ;;  %v2622_v26 = vld [vmem:[#allocation6 + $0xa8] ss:$12 sps:$4 sm:$0xff]  }
  0x23   :  { %v2397_v22 = vld [vmem:[#allocation4 + $0x38] ss:$12 sps:$4 sm:$0xff]   ;;  %v2402_v25 = vld [vmem:[#allocation4 + $0x20] ss:$12 sps:$4 sm:$0xff]   ;;  %v2406_v28 = vld [vmem:[#allocation4 + $0x8] ss:$12 sps:$4 sm:$0xff]  }
  0x24   :  { %2164 = vmatpush3.bf16.msra.mxu1 %v2379_v11  ;;  %v2620_v24 = vld [vmem:[#allocation6 + $0xac] ss:$12 sps:$4 sm:$0xff]   ;;  %v2625_v27 = vld [vmem:[#allocation6 + $0x94] ss:$12 sps:$4 sm:$0xff]   ;;  %v2628_v29 = vld [vmem:[#allocation6 + $0x90] ss:$12 sps:$4 sm:$0xff]  }
  0x25   :  { %268 = vmatpush1.bf16.msra.mxu0 %v2362_v6  ;;  %2165 = vmatprep.subr.bf16.mxu1 %v2384_v14  ;;  %v2632_v30 = vld [vmem:[#allocation6 + $0x7c] ss:$12 sps:$4 sm:$0xff]   ;;  %v2638_v32 = vld [vmem:[#allocation6 + $0x78] ss:$12 sps:$4 sm:$0xff]   ;;  %v3402_v35 = vmov 0.0   ;;  %v2398_v37 = vld [vmem:[%s3394_s0 + $0x10] sm:$0xff]  }
  0x26   :  { %269 = vmatprep.subr.bf16.mxu0 %v2363_v7  ;;  %v2389_v31 = vld [vmem:[%s3394_s0 + $0x8] sm:$0xff]   ;;  %v2641_v33 = vld [vmem:[#allocation6 + $0x64] ss:$12 sps:$4 sm:$0xff]   ;;  %v2664_v41 = vld [vmem:[#allocation6 + $0x34] ss:$12 sps:$4 sm:$0xff]   ;;  %vm2577_vm0 = vmmov 0  }
  0x27   :  { %v2643_v34 = vld [vmem:[#allocation6 + $0xb0] ss:$12 sps:$4 sm:$0xff]   ;;  %v2647_v36 = vld [vmem:[#allocation6 + $0x60] ss:$12 sps:$4 sm:$0xff]   ;;  %v2657_v39 = vld [vmem:[#allocation6 + $0x98] ss:$12 sps:$4 sm:$0xff]  }
  0x28   :  { %2166 = vmatpush3.bf16.msra.mxu1 %v2384_v14  ;;  %v2654_v38 = vld [vmem:[#allocation6 + $0x4c] ss:$12 sps:$4 sm:$0xff]   ;;  %v2661_v40 = vld [vmem:[#allocation6 + $0x48] ss:$12 sps:$4 sm:$0xff]   ;;  %v2674_v44 = vld [vmem:[#allocation6 + $0x30] ss:$12 sps:$4 sm:$0xff]  }
  0x29   :  { %270 = vmatpush1.bf16.msra.mxu0 %v2365_v9  ;;  %2167 = vmatprep.subr.bf16.mxu1 %v2388_v16  ;;  %v2667_v42 = vld [vmem:[#allocation6 + $0x80] ss:$12 sps:$4 sm:$0xff]   ;;  %v2407_v43 = vld [vmem:[%s3394_s0 + $0x18] sm:$0xff]   ;;  %v2681_v46 = vld [vmem:[#allocation6 + $0x68] ss:$12 sps:$4 sm:$0xff]   ;;  %v2578_v53 = vmov 0.0|0.0  }
  0x2a   :  { %271 = vmatprep.subr.bf16.mxu0 %v2366_v10  ;;  %v2678_v45 = vld [vmem:[#allocation6 + $0x1c] ss:$12 sps:$4 sm:$0xff]   ;;  %v2687_v47 = vld [vmem:[#allocation6 + $0x18] ss:$12 sps:$4 sm:$0xff]   ;;  %v2697_v50 = vld [vmem:[#allocation6] ss:$12 sps:$4 sm:$0xff]  }
  0x2b   :  { %v2690_v48 = vld [vmem:[#allocation6 + $0x4] ss:$12 sps:$4 sm:$0xff]   ;;  %v2708_v52 = vld [vmem:[#allocation6 + $0x20] ss:$12 sps:$4 sm:$0xff]   ;;  %v2715_v54 = vld [vmem:[#allocation6 + $0x8] ss:$12 sps:$4 sm:$0xff]  }
  0x2c   :  { %2168 = vmatpush3.bf16.msra.mxu1 %v2388_v16  ;;  %v2693_v49 = vld [vmem:[#allocation6 + $0x50] ss:$12 sps:$4 sm:$0xff]   ;;  %v2702_v51 = vld [vmem:[#allocation6 + $0x38] ss:$12 sps:$4 sm:$0xff]   ;;  %v2752_v56 = vshrl.u32 %v96_v55, 7 }
  0x2d   :  { %272 = vmatpush1.bf16.msra.mxu0 %v2368_v13  ;;  %2169 = vmatprep.subr.bf16.mxu1 %v2393_v19  ;;  %v94_v58 = vld [vmem:[%s3396_s2] sm:$0x7] }
  0x2e   :  { %273 = vmatprep.subr.bf16.mxu0 %v2369_v15  ;;  %v98_v57 = vsub.s32 0, %v2752_v56  ;;  %v102_v60 = vsub.s32 1, %v2752_v56  ;;  %v106_v63 = vsub.s32 2, %v2752_v56 }
  0x30   :  { %2170 = vmatpush3.bf16.msra.mxu1 %v2393_v19  ;;  %v99_v62 = vrot.slane %v94_v58, %v98_v57  ;;  %v103_v2 = vrot.slane %v94_v58, %v102_v60  ;;  %v2764_v6 = vrot.slane %v94_v58, %v106_v63 }
  0x31   :  { %274 = vmatpush1.bf16.msra.mxu0 %v2371_v17  ;;  %2171 = vmatprep.subr.bf16.mxu1 %v2397_v22 }
  0x32   :  { %275 = vmatprep.subr.bf16.mxu0 %v2372_v18 }
  0x34   :  { %2172 = vmatpush3.bf16.msra.mxu1 %v2397_v22 }
  0x35   :  { %276 = vmatpush1.bf16.msra.mxu0 %v2374_v20  ;;  %2173 = vmatprep.subr.bf16.mxu1 %v2402_v25 }
  0x36   :  { %277 = vmatprep.subr.bf16.mxu0 %v2376_v21 }
  0x38   :  { %2174 = vmatpush3.bf16.msra.mxu1 %v2402_v25 }
  0x39   :  { %278 = vmatpush1.bf16.msra.mxu0 %v2378_v23  ;;  %2175 = vmatprep.subr.bf16.mxu1 %v2406_v28 }
  0x3a   :  { %591 = vmatprep.subr.bf16.mxu0 %v2620_v24 }
  0x3c   :  { %296 = vmatmul.mubr.bf16.vlgmr.msra.gmra.mxu0 %v2380_v12  ;;  %2176 = vmatpush3.bf16.msra.mxu1 %v2406_v28 }
  0x3d   :  { %592 = vmatpush1.bf16.msra.mxu0 %v2622_v26  ;;  %305 = vmatprep.mubr.bf16.mxu0 %v3400_v0 }
  0x3e   :  { %593 = vmatprep.subr.bf16.mxu0 %v2625_v27  ;;  %2185 = vmatprep.subr.bf16.mxu1 %v3402_v35 }
  0x3f   :  { %2178 = vmatmul.mubr.bf16.vlgmr.msra.gmra.mxu1 %v2389_v31 }
  0x40   :  { %2186 = vmatpush3.bf16.msra.mxu1 %v2643_v34  ;;  %2181 = vmatprep.mubr.bf16.mxu1 %v2398_v37 }
  0x41   :  { %594 = vmatpush1.bf16.msra.mxu0 %v2628_v29  ;;  %2187 = vmatprep.subr.bf16.mxu1 %v3402_v35 }
  0x42   :  { %595 = vmatprep.subr.bf16.mxu0 %v2632_v30 }
  0x44   :  { %306 = vmatmul.mubr.bf16.gmra.mxu0 %v2389_v31  ;;  %2188 = vmatpush3.bf16.msra.mxu1 %v2657_v39 }
  0x45   :  { %596 = vmatpush1.bf16.msra.mxu0 %v2638_v32  ;;  %315 = vmatprep.mubr.bf16.mxu0 %v3400_v0 }
  0x46   :  { %597 = vmatprep.subr.bf16.mxu0 %v2641_v33  ;;  %2189 = vmatprep.subr.bf16.mxu1 %v3402_v35 }
  0x47   :  { %2182 = vmatmul.mubr.bf16.gmra.mxu1 %v2407_v43 }
  0x48   :  { %2190 = vmatpush3.bf16.msra.mxu1 %v2667_v42  ;;  %2201 = vmatprep.mubr.msk.bf16.mxu1 %vm2577_vm0, %v3402_v35 }
  0x49   :  { %598 = vmatpush1.bf16.msra.mxu0 %v2647_v36  ;;  %2191 = vmatprep.subr.bf16.mxu1 %v3402_v35 }
  0x4a   :  { %599 = vmatprep.subr.bf16.mxu0 %v2654_v38 }
  0x4c   :  { %316 = vmatmul.mubr.bf16.gmra.mxu0 %v2398_v37  ;;  %2192 = vmatpush3.bf16.msra.mxu1 %v2681_v46 }
  0x4d   :  { %600 = vmatpush1.bf16.msra.mxu0 %v2661_v40  ;;  %325 = vmatprep.mubr.bf16.mxu0 %v3400_v0 }
  0x4e   :  { %601 = vmatprep.subr.bf16.mxu0 %v2664_v41  ;;  %2193 = vmatprep.subr.bf16.mxu1 %v3402_v35 }
  0x50   :  { %2194 = vmatpush3.bf16.msra.mxu1 %v2693_v49 }
  0x51   :  { %602 = vmatpush1.bf16.msra.mxu0 %v2674_v44  ;;  %2195 = vmatprep.subr.bf16.mxu1 %v3402_v35 }
  0x52   :  { %603 = vmatprep.subr.bf16.mxu0 %v2678_v45 }
  0x54   :  { %326 = vmatmul.mubr.bf16.gmra.mxu0 %v2407_v43  ;;  %2196 = vmatpush3.bf16.msra.mxu1 %v2702_v51 }
  0x55   :  { %604 = vmatpush1.bf16.msra.mxu0 %v2687_v47  ;;  %623 = vmatprep.mubr.bf16.mxu0 %v3400_v0 }
  0x56   :  { %605 = vmatprep.subr.bf16.mxu0 %v2690_v48  ;;  %2197 = vmatprep.subr.bf16.mxu1 %v3402_v35 }
  0x58   :  { %2198 = vmatpush3.bf16.msra.mxu1 %v2708_v52 }
  0x59   :  { %606 = vmatpush1.bf16.msra.mxu0 %v2697_v50  ;;  %2199 = vmatprep.subr.bf16.mxu1 %v3402_v35 }
  0x5a   :  { %769 = vmatprep.subr.bf16.mxu0 %v2620_v24 }
  0x5c   :  { %624 = vmatmul.mubr.bf16.vlgmr.msra.gmra.mxu0 %v2578_v53  ;;  %2200 = vmatpush3.bf16.msra.mxu1 %v2715_v54 }
  0x5d   :  { %770 = vmatpush1.bf16.msra.mxu0 %v2622_v26  ;;  %801 = vmatprep.mubr.bf16.mxu0 %v3400_v0 }
  0x5e   :  { %771 = vmatprep.subr.bf16.mxu0 %v2625_v27  ;;  %2205 = vmatprep.subr.bf16.mxu1 %v3402_v35 }
  0x5f   :  { %2202 = vmatmul.mubr.bf16.vlgmr.msra.gmra.mxu1 %v2578_v53 }
  0x60   :  { %2206 = vmatpush3.bf16.msra.mxu1 %v2643_v34  ;;  %2221 = vmatprep.mubr.msk.bf16.mxu1 %vm2577_vm0, %v3402_v35 }
  0x61   :  { %772 = vmatpush1.bf16.msra.mxu0 %v2628_v29  ;;  %2207 = vmatprep.subr.bf16.mxu1 %v3402_v35 }
  0x62   :  { %773 = vmatprep.subr.bf16.mxu0 %v2632_v30 }
  0x64   :  { %2208 = vmatpush3.bf16.msra.mxu1 %v2657_v39 }
  0x65   :  { %774 = vmatpush1.bf16.msra.mxu0 %v2638_v32  ;;  %2209 = vmatprep.subr.bf16.mxu1 %v3402_v35 }
  0x66   :  { %775 = vmatprep.subr.bf16.mxu0 %v2641_v33 }
  0x68   :  { %2210 = vmatpush3.bf16.msra.mxu1 %v2667_v42 }
  0x69   :  { %776 = vmatpush1.bf16.msra.mxu0 %v2647_v36  ;;  %2211 = vmatprep.subr.bf16.mxu1 %v3402_v35 }
  0x6a   :  { %777 = vmatprep.subr.bf16.mxu0 %v2654_v38 }
  0x6c   :  { %2212 = vmatpush3.bf16.msra.mxu1 %v2681_v46 }
  0x6d   :  { %778 = vmatpush1.bf16.msra.mxu0 %v2661_v40  ;;  %2213 = vmatprep.subr.bf16.mxu1 %v3402_v35 }
  0x6e   :  { %779 = vmatprep.subr.bf16.mxu0 %v2664_v41 }
  0x70   :  { %2214 = vmatpush3.bf16.msra.mxu1 %v2693_v49 }
  0x71   :  { %780 = vmatpush1.bf16.msra.mxu0 %v2674_v44  ;;  %2215 = vmatprep.subr.bf16.mxu1 %v3402_v35 }
  0x72   :  { %781 = vmatprep.subr.bf16.mxu0 %v2678_v45 }
  0x74   :  { %2216 = vmatpush3.bf16.msra.mxu1 %v2702_v51 }
  0x75   :  { %782 = vmatpush1.bf16.msra.mxu0 %v2687_v47  ;;  %2217 = vmatprep.subr.bf16.mxu1 %v3402_v35 }
  0x76   :  { %783 = vmatprep.subr.bf16.mxu0 %v2690_v48 }
  0x78   :  { %2218 = vmatpush3.bf16.msra.mxu1 %v2708_v52 }
  0x79   :  { %784 = vmatpush1.bf16.msra.mxu0 %v2697_v50  ;;  %2219 = vmatprep.subr.bf16.mxu1 %v3402_v35 }
  0x7a   :  { %941 = vmatprep.subr.bf16.mxu0 %v2620_v24 }
  0x7c   :  { %2220 = vmatpush3.bf16.msra.mxu1 %v2715_v54 }
  0x7d   :  { %2225 = vmatprep.subr.bf16.mxu1 %v3402_v35 }
  0xfc   :  { %v297_v59 = vpop.f32.mrf.mxu0 }
  0xfe   :  { %v299_v61 = vpop.f32.mrf.mxu0 }
  0xff   :  { %v2179_v10 = vpop.f32.mrf.mxu1  ;;  %v300_v35 = vadd.f32 %v299_v61, %v103_v2 }
 0x100   :  { %v301_v1 = vpop.f32.mrf.mxu0  ;;  %v2771_v12 = vadd.f32 %v2179_v10, %v2764_v6 }
 0x101   :  { %v2760_v3 = vadd.f32 %v301_v1, %v99_v62  ;;  %v370_v14 = vpop.f32.mrf.mxu1 }
 0x102   :  { %v303_v4 = vpop.f32.mrf.mxu0  ;;  %v371_v61 = vadd.f32 %v370_v14, %v2764_v6 }
 0x103   :  { %v2762_v5 = vadd.f32 %v303_v4, %v103_v2  ;;  %v2180_v17 = vpop.f32.mrf.mxu1 }
 0x104   :  { %v307_v7 = vpop.f32.mrf.mxu0  ;;  %v2778_v19 = vadd.f32 %v2180_v17, %v2764_v6 }
 0x105   :  { %v2766_v8 = vadd.f32 %v307_v7, %v99_v62  ;;  %v373_v21 = vpop.f32.mrf.mxu1 }
 0x106   :  { %v309_v9 = vpop.f32.mrf.mxu0  ;;  %v2783_v23 = vadd.f32 %v373_v21, %v2764_v6 }
 0x107   :  { %v2768_v11 = vadd.f32 %v309_v9, %v103_v2  ;;  %v2183_v28 = vpop.f32.mrf.mxu1 }
 0x108   :  { %v311_v13 = vpop.f32.mrf.mxu0  ;;  %v2788_v37 = vadd.f32 %v2183_v28, %v2764_v6 }
 0x109   :  { %v2773_v15 = vadd.f32 %v311_v13, %v99_v62  ;;  %v386_v53 = vpop.f32.mrf.mxu1 }
 0x10a   :  { %v313_v16 = vpop.f32.mrf.mxu0  ;;  %3404 = vst [vmem:[#allocation10_spill] sm:$0xff] %v2788_v37  ;;  %v2793_v57 = vadd.f32 %v386_v53, %v2764_v6 }
 0x10b   :  { %v2775_v18 = vadd.f32 %v313_v16, %v103_v2  ;;  %v2184_v60 = vpop.f32.mrf.mxu1 }
 0x10c   :  { %v317_v20 = vpop.f32.mrf.mxu0  ;;  %v2798_v1 = vadd.f32 %v2184_v60, %v2764_v6 }
 0x10d   :  { %v2780_v22 = vadd.f32 %v317_v20, %v99_v62  ;;  %v389_v7 = vpop.f32.mrf.mxu1 }
 0x10e   :  { %v319_v25 = vpop.f32.mrf.mxu0  ;;  %3405 = vst [vmem:[#allocation11_spill] sm:$0xff] %v2798_v1  ;;  %v2803_v10 = vadd.f32 %v389_v7, %v2764_v6 }
 0x10f   :  { %v2785_v31 = vadd.f32 %v319_v25, %v103_v2  ;;  %v298_v25 = vadd.f32 %v297_v59, %v99_v62  ;;  %v2814_v59 = vld [vmem:[%s3398_s4] ss:$0 sm:$0xff] }
 0x110   :  { %v321_v43 = vpop.f32.mrf.mxu0 }
 0x111   :  { %v2790_v55 = vadd.f32 %v321_v43, %v99_v62 }
 0x112   :  { %v323_v58 = vpop.f32.mrf.mxu0 }
 0x113   :  { %v2795_v63 = vadd.f32 %v323_v58, %v103_v2 }
 0x114   :  { %v327_v4 = vpop.f32.mrf.mxu0 }
 0x115   :  { %v2800_v9 = vadd.f32 %v327_v4, %v99_v62 }
 0x116   :  { %v329_v13 = vpop.f32.mrf.mxu0 }
 0x117   :  { %3406 = vst [vmem:[#allocation12_spill] sm:$0xff] %v2800_v9  ;;  %v2805_v16 = vadd.f32 %v329_v13, %v103_v2 }
 0x118   :  { %v331_v17 = vpop.f32.mrf.mxu0 }
 0x119   :  { %3407 = vst [vmem:[#allocation13_spill] sm:$0xff] %v2805_v16  ;;  %v2807_v20 = vadd.f32 %v331_v17, %v99_v62 }
 0x11a   :  { %v333_v21 = vpop.f32.mrf.mxu0 }
 0x11b   :  { %3408 = vst [vmem:[#allocation14_spill] sm:$0xff] %v2807_v20  ;;  %v2809_v28 = vadd.f32 %v333_v21, %v103_v2 }
 0x11c   :  { %v625_v43 = vpop.f32.mrf.mxu0 }
 0x11d   :  { %v672_v53 = vadd.f32 %v625_v43, %v298_v25 }
 0x11e   :  { %v627_v58 = vpop.f32.mrf.mxu0 }
 0x11f   :  { %v2028_v60 = vmul.f32 -1.442695, %v672_v53  ;;  %v666_v7 = vpop.f32.mrf.mxu1  ;;  %v679_v1 = vadd.f32 %v627_v58, %v300_v35 }
 0x120   :  { %v629_v0 = vpop.f32.mrf.mxu0 }
 0x121   :  { %2422 = vpow2.f32 %v2028_v60  ;;  %v2203_v37 = vpop.f32.mrf.mxu1  ;;  %v2029_v16 = vmul.f32 -1.442695, %v679_v1  ;;  %v692_v0 = vadd.f32 %v2814_v59, %v666_v7  ;;  %v2579_v1 = vmov 1966171168  }
 0x122   :  { %v630_v4 = vpop.f32.mrf.mxu0 }
 0x123   :  { %v669_v13 = vpop.f32.mrf.mxu1  ;;  %2424 = vpow2.f32 %v2029_v16 }
 0x125   :  { %v2204_v9 = vpop.f32.mrf.mxu1 }
 0x126   :  { %v702_v9 = vunpack.c.l.s4 %v2579_v1 }
 0x128   :  { %v703_v16 = vunpack.c.0.s8 %v702_v9 }
 0x12a   :  { %v2819_v58 = vsub.s32 %v703_v16, %v2752_v56 }
 0x12e   :  { %v2423_v17 = vpop.eup %2422 }
 0x12f   :  { %v676_v20 = vadd.f32 1.0, %v2423_v17 }
 0x130   :  { %v2425_v62 = vpop.eup %2424 }
 0x131   :  { %2426 = vrcp.f32 %v676_v20  ;;  %v683_v2 = vadd.f32 1.0, %v2425_v62 }
 0x13e   :  { %v2427_v21 = vpop.eup %2426 }
 0x13f   :  { %v693_v35 = vmul.f32 %v2427_v21, %v692_v0 }
 0x141   :  { %v694_v37 = vadd.f32 %v693_v35, %v371_v61  ;;  %v3409_v61 = vmov 0.0   ;;  %v3410_v35 = vmov 0  }
 0x143   :  { %2428 = vtanh.f32 %v694_v37 }
 0x144   :  { %2430 = vrcp.f32 %v683_v2 }
 0x150   :  { %v2429_v20 = vpop.eup %2428 }
 0x151   :  { %v696_v25 = vsub.f32 0.0, %v2429_v20  ;;  %v2431_v43 = vpop.eup %2430 }
 0x153   :  { %v697_v53 = vmul.f32 %v2431_v43, %v696_v25 }
 0x155   :  { %v2821_v60 = vadd.f32 %v2429_v20, %v697_v53 }
 0x157   :  { %v700_v6 = vcombine.high %v2821_v60, %v2821_v60  ;;  %v707_v14 = vrot.slane %v2821_v60, %v2819_v58  ;;  %v768_v4 = vpack.c.bf16 %v2821_v60, %v2821_v60 }
 0x159   :  { %v714_v7 = vrot.slane %v700_v6, %v2819_v58  ;;  %v715_v13 = vcombine.high %v707_v14, %v707_v14  ;;  %v723_v17 = vrot.slane %v707_v14, %v2819_v58  ;;  %2031 = vst.sshfl [vmem:[%s3399_s5] sm:$0x1 pattern:$0x73625140] %v707_v14  ;;  %802 = vmatmul.mubr.bf16.vlgmr.msra.gmra.mxu0 %v768_v4 }
 0x15a   :  { %2222 = vmatmul.mubr.bf16.vlgmr.msra.gmra.mxu1 %v768_v4  ;;  %942 = vmatpush1.bf16.msra.mxu0 %v2622_v26 }
 0x15b   :  { %2226 = vmatpush3.bf16.msra.mxu1 %v2643_v34  ;;  %v716_v56 = vcombine.high %v714_v7, %v714_v7  ;;  %v730_v0 = vrot.slane %v714_v7, %v2819_v58  ;;  %v737_v62 = vrot.slane %v715_v13, %v2819_v58  ;;  %v745_v21 = vcombine.high %v723_v17, %v723_v17 }
 0x15c   :  { %2032 = vst.sshfl [vmem:[%s3399_s5 + $0x8] sm:$0x1 pattern:$0x73625140] %v715_v13  ;;  %943 = vmatprep.subr.bf16.mxu0 %v2625_v27  ;;  %2227 = vmatprep.subr.bf16.mxu1 %v3409_v61 }
 0x15d   :  { %2033 = vst.sshfl [vmem:[%s3399_s5 + $0x20] sm:$0x1 pattern:$0x73625140] %v714_v7  ;;  %973 = vmatprep.mubr.bf16.mxu0 %v3410_v35  ;;  %v744_v2 = vrot.slane %v716_v56, %v2819_v58  ;;  %v746_v37 = vcombine.high %v730_v0, %v730_v0  ;;  %v747_v1 = vcombine.high %v737_v62, %v737_v62  ;;  %759 = vst [vmem:[%s3399_s5 + $0x10] sm:$0x1] %v745_v21 }
 0x15e   :  { %2034 = vst.sshfl [vmem:[%s3399_s5 + $0x28] sm:$0x1 pattern:$0x73625140] %v716_v56  ;;  %2241 = vmatprep.mubr.msk.bf16.mxu1 %vm2577_vm0, %v3409_v61  ;;  %944 = vmatpush1.bf16.msra.mxu0 %v2628_v29 }
 0x15f   :  { %2228 = vmatpush3.bf16.msra.mxu1 %v2657_v39  ;;  %v748_v9 = vcombine.high %v744_v2, %v744_v2  ;;  %760 = vst [vmem:[%s3399_s5 + $0x18] sm:$0x1] %v747_v1  ;;  %763 = vst [vmem:[%s3399_s5 + $0x30] sm:$0x1] %v746_v37  ;;  %945 = vmatprep.subr.bf16.mxu0 %v2632_v30 }
 0x160   :  { %2229 = vmatprep.subr.bf16.mxu1 %v3409_v61 }
 0x161   :  { %764 = vst [vmem:[%s3399_s5 + $0x38] sm:$0x1] %v748_v9 }
 0x162   :  { %946 = vmatpush1.bf16.msra.mxu0 %v2638_v32 }
 0x163   :  { %2230 = vmatpush3.bf16.msra.mxu1 %v2667_v42  ;;  %947 = vmatprep.subr.bf16.mxu0 %v2641_v33 }
 0x164   :  { %2231 = vmatprep.subr.bf16.mxu1 %v3409_v61 }
 0x166   :  { %948 = vmatpush1.bf16.msra.mxu0 %v2647_v36 }
 0x167   :  { %2232 = vmatpush3.bf16.msra.mxu1 %v2681_v46  ;;  %949 = vmatprep.subr.bf16.mxu0 %v2654_v38 }
 0x168   :  { %2233 = vmatprep.subr.bf16.mxu1 %v3409_v61 }
 0x16a   :  { %950 = vmatpush1.bf16.msra.mxu0 %v2661_v40 }
 0x16b   :  { %2234 = vmatpush3.bf16.msra.mxu1 %v2693_v49  ;;  %951 = vmatprep.subr.bf16.mxu0 %v2664_v41 }
 0x16c   :  { %2235 = vmatprep.subr.bf16.mxu1 %v3409_v61 }
 0x16e   :  { %952 = vmatpush1.bf16.msra.mxu0 %v2674_v44 }
 0x16f   :  { %2236 = vmatpush3.bf16.msra.mxu1 %v2702_v51  ;;  %953 = vmatprep.subr.bf16.mxu0 %v2678_v45 }
 0x170   :  { %2237 = vmatprep.subr.bf16.mxu1 %v3409_v61 }
 0x172   :  { %954 = vmatpush1.bf16.msra.mxu0 %v2687_v47 }
 0x173   :  { %2238 = vmatpush3.bf16.msra.mxu1 %v2708_v52  ;;  %955 = vmatprep.subr.bf16.mxu0 %v2690_v48 }
 0x174   :  { %2239 = vmatprep.subr.bf16.mxu1 %v3409_v61 }
 0x176   :  { %956 = vmatpush1.bf16.msra.mxu0 %v2697_v50 }
 0x177   :  { %2240 = vmatpush3.bf16.msra.mxu1 %v2715_v54  ;;  %1113 = vmatprep.subr.bf16.mxu0 %v2620_v24 }
 0x178   :  { %2245 = vmatprep.subr.bf16.mxu1 %v3409_v61 }
 0x219   :  { %v803_v16 = vpop.f32.mrf.mxu0 }
 0x21a   :  { %v844_v20 = vpop.f32.mrf.mxu1  ;;  %v850_v25 = vadd.f32 %v803_v16, %v2760_v3 }
 0x21b   :  { %v805_v43 = vpop.f32.mrf.mxu0  ;;  %v864_v2 = vadd.f32 %v2814_v59, %v844_v20 }
 0x21c   :  { %v2223_v53 = vpop.f32.mrf.mxu1  ;;  %v2035_v6 = vmul.f32 -1.442695, %v850_v25  ;;  %v857_v17 = vadd.f32 %v805_v43, %v2762_v5 }
 0x21d   :  { %v807_v14 = vpop.f32.mrf.mxu0 }
 0x21e   :  { %v847_v4 = vpop.f32.mrf.mxu1  ;;  %2432 = vpow2.f32 %v2035_v6  ;;  %v2036_v56 = vmul.f32 -1.442695, %v857_v17 }
 0x21f   :  { %v808_v7 = vpop.f32.mrf.mxu0 }
 0x220   :  { %v2224_v13 = vpop.f32.mrf.mxu1  ;;  %2434 = vpow2.f32 %v2036_v56 }
 0x22b   :  { %v2433_v0 = vpop.eup %2432 }
 0x22c   :  { %v854_v62 = vadd.f32 1.0, %v2433_v0 }
 0x22d   :  { %v2435_v21 = vpop.eup %2434 }
 0x22e   :  { %2436 = vrcp.f32 %v854_v62  ;;  %v861_v9 = vadd.f32 1.0, %v2435_v21 }
 0x23b   :  { %v2437_v37 = vpop.eup %2436 }
 0x23c   :  { %v865_v3 = vmul.f32 %v2437_v37, %v864_v2 }
 0x23e   :  { %v866_v1 = vadd.f32 %v865_v3, %v2783_v23 }
 0x240   :  { %2438 = vtanh.f32 %v866_v1 }
 0x241   :  { %2440 = vrcp.f32 %v861_v9 }
 0x24d   :  { %v2439_v16 = vpop.eup %2438 }
 0x24e   :  { %v868_v25 = vsub.f32 %v2821_v60, %v2439_v16  ;;  %v2441_v53 = vpop.eup %2440 }
 0x250   :  { %v869_v5 = vmul.f32 %v2441_v53, %v868_v25 }
 0x252   :  { %v2898_v43 = vadd.f32 %v2439_v16, %v869_v5 }
 0x254   :  { %v872_v6 = vcombine.high %v2898_v43, %v2898_v43  ;;  %v879_v20 = vrot.slane %v2898_v43, %v2819_v58  ;;  %v940_v14 = vpack.c.bf16 %v2898_v43, %v2898_v43 }
 0x256   :  { %v886_v23 = vrot.slane %v872_v6, %v2819_v58  ;;  %v887_v4 = vcombine.high %v879_v20, %v879_v20  ;;  %v895_v7 = vrot.slane %v879_v20, %v2819_v58  ;;  %2037 = vst.sshfl [vmem:[%s3399_s5 + $0x1] sm:$0x1 pattern:$0x73625140] %v879_v20  ;;  %974 = vmatmul.mubr.bf16.vlgmr.msra.gmra.mxu0 %v940_v14 }
 0x257   :  { %2242 = vmatmul.mubr.bf16.vlgmr.msra.gmra.mxu1 %v940_v14  ;;  %1114 = vmatpush1.bf16.msra.mxu0 %v2622_v26 }
 0x258   :  { %2246 = vmatpush3.bf16.msra.mxu1 %v2643_v34  ;;  %v888_v60 = vcombine.high %v886_v23, %v886_v23  ;;  %v902_v13 = vrot.slane %v886_v23, %v2819_v58  ;;  %v909_v17 = vrot.slane %v887_v4, %v2819_v58  ;;  %v917_v56 = vcombine.high %v895_v7, %v895_v7 }
 0x259   :  { %2038 = vst.sshfl [vmem:[%s3399_s5 + $0x9] sm:$0x1 pattern:$0x73625140] %v887_v4  ;;  %1115 = vmatprep.subr.bf16.mxu0 %v2625_v27  ;;  %2247 = vmatprep.subr.bf16.mxu1 %v3409_v61 }
 0x25a   :  { %2039 = vst.sshfl [vmem:[%s3399_s5 + $0x21] sm:$0x1 pattern:$0x73625140] %v886_v23  ;;  %1145 = vmatprep.mubr.bf16.mxu0 %v3410_v35  ;;  %v916_v0 = vrot.slane %v888_v60, %v2819_v58  ;;  %v918_v62 = vcombine.high %v902_v13, %v902_v13  ;;  %v919_v21 = vcombine.high %v909_v17, %v909_v17  ;;  %931 = vst [vmem:[%s3399_s5 + $0x11] sm:$0x1] %v917_v56 }
 0x25b   :  { %2040 = vst.sshfl [vmem:[%s3399_s5 + $0x29] sm:$0x1 pattern:$0x73625140] %v888_v60  ;;  %2261 = vmatprep.mubr.msk.bf16.mxu1 %vm2577_vm0, %v3409_v61  ;;  %1116 = vmatpush1.bf16.msra.mxu0 %v2628_v29 }
 0x25c   :  { %2248 = vmatpush3.bf16.msra.mxu1 %v2657_v39  ;;  %v920_v2 = vcombine.high %v916_v0, %v916_v0  ;;  %932 = vst [vmem:[%s3399_s5 + $0x19] sm:$0x1] %v919_v21  ;;  %935 = vst [vmem:[%s3399_s5 + $0x31] sm:$0x1] %v918_v62  ;;  %1117 = vmatprep.subr.bf16.mxu0 %v2632_v30 }
 0x25d   :  { %2249 = vmatprep.subr.bf16.mxu1 %v3409_v61 }
 0x25e   :  { %936 = vst [vmem:[%s3399_s5 + $0x39] sm:$0x1] %v920_v2 }
 0x25f   :  { %1118 = vmatpush1.bf16.msra.mxu0 %v2638_v32 }
 0x260   :  { %2250 = vmatpush3.bf16.msra.mxu1 %v2667_v42  ;;  %1119 = vmatprep.subr.bf16.mxu0 %v2641_v33 }
 0x261   :  { %2251 = vmatprep.subr.bf16.mxu1 %v3409_v61 }
 0x263   :  { %1120 = vmatpush1.bf16.msra.mxu0 %v2647_v36 }
 0x264   :  { %2252 = vmatpush3.bf16.msra.mxu1 %v2681_v46  ;;  %1121 = vmatprep.subr.bf16.mxu0 %v2654_v38 }
 0x265   :  { %2253 = vmatprep.subr.bf16.mxu1 %v3409_v61 }
 0x267   :  { %1122 = vmatpush1.bf16.msra.mxu0 %v2661_v40 }
 0x268   :  { %2254 = vmatpush3.bf16.msra.mxu1 %v2693_v49  ;;  %1123 = vmatprep.subr.bf16.mxu0 %v2664_v41 }
 0x269   :  { %2255 = vmatprep.subr.bf16.mxu1 %v3409_v61 }
 0x26b   :  { %1124 = vmatpush1.bf16.msra.mxu0 %v2674_v44 }
 0x26c   :  { %2256 = vmatpush3.bf16.msra.mxu1 %v2702_v51  ;;  %1125 = vmatprep.subr.bf16.mxu0 %v2678_v45 }
 0x26d   :  { %2257 = vmatprep.subr.bf16.mxu1 %v3409_v61 }
 0x26f   :  { %1126 = vmatpush1.bf16.msra.mxu0 %v2687_v47 }
 0x270   :  { %2258 = vmatpush3.bf16.msra.mxu1 %v2708_v52  ;;  %1127 = vmatprep.subr.bf16.mxu0 %v2690_v48 }
 0x271   :  { %2259 = vmatprep.subr.bf16.mxu1 %v3409_v61 }
 0x273   :  { %1128 = vmatpush1.bf16.msra.mxu0 %v2697_v50 }
 0x274   :  { %2260 = vmatpush3.bf16.msra.mxu1 %v2715_v54  ;;  %1285 = vmatprep.subr.bf16.mxu0 %v2620_v24 }
 0x275   :  { %2265 = vmatprep.subr.bf16.mxu1 %v3409_v61 }
 0x316   :  { %v975_v37 = vpop.f32.mrf.mxu0 }
 0x317   :  { %v1016_v3 = vpop.f32.mrf.mxu1  ;;  %v1022_v1 = vadd.f32 %v975_v37, %v2766_v8 }
 0x318   :  { %v977_v9 = vpop.f32.mrf.mxu0  ;;  %v1036_v13 = vadd.f32 %v2814_v59, %v1016_v3 }
 0x319   :  { %v2243_v16 = vpop.f32.mrf.mxu1  ;;  %v2041_v25 = vmul.f32 -1.442695, %v1022_v1  ;;  %v1029_v14 = vadd.f32 %v977_v9, %v2768_v11 }
 0x31a   :  { %v979_v53 = vpop.f32.mrf.mxu0 }
 0x31b   :  { %v1019_v5 = vpop.f32.mrf.mxu1  ;;  %2442 = vpow2.f32 %v2041_v25  ;;  %v2042_v23 = vmul.f32 -1.442695, %v1029_v14 }
 0x31c   :  { %v980_v6 = vpop.f32.mrf.mxu0 }
 0x31d   :  { %v2244_v20 = vpop.f32.mrf.mxu1  ;;  %2444 = vpow2.f32 %v2042_v23 }
 0x328   :  { %v2443_v4 = vpop.eup %2442 }
 0x329   :  { %v1026_v7 = vadd.f32 1.0, %v2443_v4 }
 0x32a   :  { %v2445_v60 = vpop.eup %2444 }
 0x32b   :  { %2446 = vrcp.f32 %v1026_v7  ;;  %v1033_v0 = vadd.f32 1.0, %v2445_v60 }
 0x338   :  { %v2447_v17 = vpop.eup %2446 }
 0x339   :  { %v1037_v8 = vmul.f32 %v2447_v17, %v1036_v13 }
 0x33b   :  { %v1038_v56 = vadd.f32 %v1037_v8, %v2771_v12 }
 0x33d   :  { %2448 = vtanh.f32 %v1038_v56 }
 0x33e   :  { %2450 = vrcp.f32 %v1033_v0 }
 0x34a   :  { %v2449_v62 = vpop.eup %2448 }
 0x34b   :  { %v1040_v21 = vsub.f32 %v2898_v43, %v2449_v62  ;;  %v2451_v2 = vpop.eup %2450 }
 0x34d   :  { %v1041_v11 = vmul.f32 %v2451_v2, %v1040_v21 }
 0x34f   :  { %v2975_v37 = vadd.f32 %v2449_v62, %v1041_v11 }
 0x351   :  { %v1044_v1 = vcombine.high %v2975_v37, %v2975_v37  ;;  %v1051_v3 = vrot.slane %v2975_v37, %v2819_v58  ;;  %v1112_v9 = vpack.c.bf16 %v2975_v37, %v2975_v37 }
 0x353   :  { %v1058_v12 = vrot.slane %v1044_v1, %v2819_v58  ;;  %v1059_v16 = vcombine.high %v1051_v3, %v1051_v3  ;;  %v1067_v25 = vrot.slane %v1051_v3, %v2819_v58  ;;  %2043 = vst.sshfl [vmem:[%s3399_s5 + $0x2] sm:$0x1 pattern:$0x73625140] %v1051_v3  ;;  %1146 = vmatmul.mubr.bf16.vlgmr.msra.gmra.mxu0 %v1112_v9 }
 0x354   :  { %2262 = vmatmul.mubr.bf16.vlgmr.msra.gmra.mxu1 %v1112_v9  ;;  %1286 = vmatpush1.bf16.msra.mxu0 %v2622_v26 }
 0x355   :  { %2266 = vmatpush3.bf16.msra.mxu1 %v2643_v34  ;;  %v1060_v43 = vcombine.high %v1058_v12, %v1058_v12  ;;  %v1074_v53 = vrot.slane %v1058_v12, %v2819_v58  ;;  %v1081_v5 = vrot.slane %v1059_v16, %v2819_v58  ;;  %v1089_v6 = vcombine.high %v1067_v25, %v1067_v25 }
 0x356   :  { %2044 = vst.sshfl [vmem:[%s3399_s5 + $0xa] sm:$0x1 pattern:$0x73625140] %v1059_v16  ;;  %1287 = vmatprep.subr.bf16.mxu0 %v2625_v27  ;;  %2267 = vmatprep.subr.bf16.mxu1 %v3409_v61 }
 0x357   :  { %2045 = vst.sshfl [vmem:[%s3399_s5 + $0x22] sm:$0x1 pattern:$0x73625140] %v1058_v12  ;;  %1317 = vmatprep.mubr.bf16.mxu0 %v3410_v35  ;;  %v1088_v20 = vrot.slane %v1060_v43, %v2819_v58  ;;  %v1090_v14 = vcombine.high %v1074_v53, %v1074_v53  ;;  %v1091_v23 = vcombine.high %v1081_v5, %v1081_v5  ;;  %1103 = vst [vmem:[%s3399_s5 + $0x12] sm:$0x1] %v1089_v6 }
 0x358   :  { %2046 = vst.sshfl [vmem:[%s3399_s5 + $0x2a] sm:$0x1 pattern:$0x73625140] %v1060_v43  ;;  %2281 = vmatprep.mubr.msk.bf16.mxu1 %vm2577_vm0, %v3409_v61  ;;  %1288 = vmatpush1.bf16.msra.mxu0 %v2628_v29 }
 0x359   :  { %2268 = vmatpush3.bf16.msra.mxu1 %v2657_v39  ;;  %v1092_v4 = vcombine.high %v1088_v20, %v1088_v20  ;;  %1104 = vst [vmem:[%s3399_s5 + $0x1a] sm:$0x1] %v1091_v23  ;;  %1107 = vst [vmem:[%s3399_s5 + $0x32] sm:$0x1] %v1090_v14  ;;  %1289 = vmatprep.subr.bf16.mxu0 %v2632_v30 }
 0x35a   :  { %2269 = vmatprep.subr.bf16.mxu1 %v3409_v61 }
 0x35b   :  { %1108 = vst [vmem:[%s3399_s5 + $0x3a] sm:$0x1] %v1092_v4 }
 0x35c   :  { %1290 = vmatpush1.bf16.msra.mxu0 %v2638_v32 }
 0x35d   :  { %2270 = vmatpush3.bf16.msra.mxu1 %v2667_v42  ;;  %1291 = vmatprep.subr.bf16.mxu0 %v2641_v33 }
 0x35e   :  { %2271 = vmatprep.subr.bf16.mxu1 %v3409_v61 }
 0x360   :  { %1292 = vmatpush1.bf16.msra.mxu0 %v2647_v36 }
 0x361   :  { %2272 = vmatpush3.bf16.msra.mxu1 %v2681_v46  ;;  %1293 = vmatprep.subr.bf16.mxu0 %v2654_v38 }
 0x362   :  { %2273 = vmatprep.subr.bf16.mxu1 %v3409_v61 }
 0x364   :  { %1294 = vmatpush1.bf16.msra.mxu0 %v2661_v40 }
 0x365   :  { %2274 = vmatpush3.bf16.msra.mxu1 %v2693_v49  ;;  %1295 = vmatprep.subr.bf16.mxu0 %v2664_v41 }
 0x366   :  { %2275 = vmatprep.subr.bf16.mxu1 %v3409_v61 }
 0x368   :  { %1296 = vmatpush1.bf16.msra.mxu0 %v2674_v44 }
 0x369   :  { %2276 = vmatpush3.bf16.msra.mxu1 %v2702_v51  ;;  %1297 = vmatprep.subr.bf16.mxu0 %v2678_v45 }
 0x36a   :  { %2277 = vmatprep.subr.bf16.mxu1 %v3409_v61 }
 0x36c   :  { %1298 = vmatpush1.bf16.msra.mxu0 %v2687_v47 }
 0x36d   :  { %2278 = vmatpush3.bf16.msra.mxu1 %v2708_v52  ;;  %1299 = vmatprep.subr.bf16.mxu0 %v2690_v48 }
 0x36e   :  { %2279 = vmatprep.subr.bf16.mxu1 %v3409_v61 }
 0x370   :  { %1300 = vmatpush1.bf16.msra.mxu0 %v2697_v50 }
 0x371   :  { %2280 = vmatpush3.bf16.msra.mxu1 %v2715_v54  ;;  %1457 = vmatprep.subr.bf16.mxu0 %v2620_v24 }
 0x372   :  { %2285 = vmatprep.subr.bf16.mxu1 %v3409_v61 }
 0x413   :  { %v1147_v7 = vpop.f32.mrf.mxu0 }
 0x414   :  { %v1188_v60 = vpop.f32.mrf.mxu1  ;;  %v1194_v13 = vadd.f32 %v1147_v7, %v2773_v15 }
 0x415   :  { %v1149_v17 = vpop.f32.mrf.mxu0  ;;  %v1208_v12 = vadd.f32 %v2814_v59, %v1188_v60 }
 0x416   :  { %v2263_v8 = vpop.f32.mrf.mxu1  ;;  %v2047_v56 = vmul.f32 -1.442695, %v1194_v13  ;;  %v1201_v11 = vadd.f32 %v1149_v17, %v2775_v18 }
 0x417   :  { %v1151_v0 = vpop.f32.mrf.mxu0 }
 0x418   :  { %v1191_v62 = vpop.f32.mrf.mxu1  ;;  %2452 = vpow2.f32 %v2047_v56  ;;  %v2048_v1 = vmul.f32 -1.442695, %v1201_v11 }
 0x419   :  { %v1152_v21 = vpop.f32.mrf.mxu0 }
 0x41a   :  { %v2264_v2 = vpop.f32.mrf.mxu1  ;;  %2454 = vpow2.f32 %v2048_v1 }
 0x425   :  { %v2453_v3 = vpop.eup %2452 }
 0x426   :  { %v1198_v9 = vadd.f32 1.0, %v2453_v3 }
 0x427   :  { %v2455_v24 = vpop.eup %2454 }
 0x428   :  { %2456 = vrcp.f32 %v1198_v9  ;;  %v1205_v43 = vadd.f32 1.0, %v2455_v24 }
 0x435   :  { %v2457_v16 = vpop.eup %2456 }
 0x436   :  { %v1209_v15 = vmul.f32 %v2457_v16, %v1208_v12  ;;  %v3144_v12 = vld [vmem:[#allocation6 + $0xa8] ss:$12 sps:$4 sm:$0xff]   ;;  %v3147_v16 = vld [vmem:[#allocation6 + $0xb0] ss:$12 sps:$4 sm:$0xff]  }
 0x438   :  { %v1210_v25 = vadd.f32 %v1209_v15, %v2778_v19 }
 0x43a   :  { %2458 = vtanh.f32 %v1210_v25 }
 0x43b   :  { %2460 = vrcp.f32 %v1205_v43 }
 0x447   :  { %v2459_v53 = vpop.eup %2458 }
 0x448   :  { %v1212_v5 = vsub.f32 %v2975_v37, %v2459_v53  ;;  %v2461_v6 = vpop.eup %2460 }
 0x44a   :  { %v1213_v18 = vmul.f32 %v2461_v6, %v1212_v5  ;;  %v3158_v5 = vld [vmem:[#allocation6 + $0x94] ss:$12 sps:$4 sm:$0xff]  }
 0x44c   :  { %v3052_v20 = vadd.f32 %v2459_v53, %v1213_v18 }
 0x44e   :  { %v1216_v14 = vcombine.high %v3052_v20, %v3052_v20  ;;  %v1223_v23 = vrot.slane %v3052_v20, %v2819_v58  ;;  %v1284_v4 = vpack.c.bf16 %v3052_v20, %v3052_v20 }
 0x450   :  { %v1230_v19 = vrot.slane %v1216_v14, %v2819_v58  ;;  %v1231_v7 = vcombine.high %v1223_v23, %v1223_v23  ;;  %v1239_v60 = vrot.slane %v1223_v23, %v2819_v58  ;;  %2049 = vst.sshfl [vmem:[%s3399_s5 + $0x3] sm:$0x1 pattern:$0x73625140] %v1223_v23  ;;  %1318 = vmatmul.mubr.bf16.vlgmr.msra.gmra.mxu0 %v1284_v4  ;;  %v3172_v14 = vld [vmem:[#allocation6 + $0x90] ss:$12 sps:$4 sm:$0xff]  }
 0x451   :  { %2282 = vmatmul.mubr.bf16.vlgmr.msra.gmra.mxu1 %v1284_v4  ;;  %1458 = vmatpush1.bf16.msra.mxu0 %v2622_v26  ;;  %v3175_v23 = vld [vmem:[#allocation6 + $0x98] ss:$12 sps:$4 sm:$0xff]  }
 0x452   :  { %2286 = vmatpush3.bf16.msra.mxu1 %v2643_v34  ;;  %v1232_v37 = vcombine.high %v1230_v19, %v1230_v19  ;;  %v1246_v13 = vrot.slane %v1230_v19, %v2819_v58  ;;  %v1253_v17 = vrot.slane %v1231_v7, %v2819_v58  ;;  %v1261_v8 = vcombine.high %v1239_v60, %v1239_v60  ;;  %v3194_v60 = vld [vmem:[#allocation6 + $0x80] ss:$12 sps:$4 sm:$0xff]  }
 0x453   :  { %2050 = vst.sshfl [vmem:[%s3399_s5 + $0xb] sm:$0x1 pattern:$0x73625140] %v1231_v7  ;;  %1459 = vmatprep.subr.bf16.mxu0 %v2625_v27  ;;  %2287 = vmatprep.subr.bf16.mxu1 %v3409_v61  ;;  %v3191_v7 = vld [vmem:[#allocation6 + $0x78] ss:$12 sps:$4 sm:$0xff]  }
 0x454   :  { %2051 = vst.sshfl [vmem:[%s3399_s5 + $0x23] sm:$0x1 pattern:$0x73625140] %v1230_v19  ;;  %1489 = vmatprep.mubr.bf16.mxu0 %v3410_v35  ;;  %v1260_v26 = vrot.slane %v1232_v37, %v2819_v58  ;;  %v1262_v34 = vcombine.high %v1246_v13, %v1246_v13  ;;  %v1263_v56 = vcombine.high %v1253_v17, %v1253_v17  ;;  %1275 = vst [vmem:[%s3399_s5 + $0x13] sm:$0x1] %v1261_v8 }
 0x455   :  { %2052 = vst.sshfl [vmem:[%s3399_s5 + $0x2b] sm:$0x1 pattern:$0x73625140] %v1232_v37  ;;  %2301 = vmatprep.mubr.msk.bf16.mxu1 %vm2577_vm0, %v3409_v61  ;;  %1460 = vmatpush1.bf16.msra.mxu0 %v2628_v29  ;;  %v3122_v29 = vld [vmem:[#allocation6 + $0xac] ss:$12 sps:$4 sm:$0xff]  }
 0x456   :  { %2288 = vmatpush3.bf16.msra.mxu1 %v2657_v39  ;;  %v1264_v27 = vcombine.high %v1260_v26, %v1260_v26  ;;  %1276 = vst [vmem:[%s3399_s5 + $0x1b] sm:$0x1] %v1263_v56  ;;  %1279 = vst [vmem:[%s3399_s5 + $0x33] sm:$0x1] %v1262_v34  ;;  %1461 = vmatprep.subr.bf16.mxu0 %v2632_v30  ;;  %v3184_v19 = vld [vmem:[#allocation6 + $0x7c] ss:$12 sps:$4 sm:$0xff]  }
 0x457   :  { %2289 = vmatprep.subr.bf16.mxu1 %v3409_v61  ;;  %v3197_v37 = vld [vmem:[#allocation6 + $0x64] ss:$12 sps:$4 sm:$0xff]   ;;  %v3201_v13 = vld [vmem:[#allocation6 + $0x60] ss:$12 sps:$4 sm:$0xff]   ;;  %v3204_v17 = vld [vmem:[#allocation6 + $0x68] ss:$12 sps:$4 sm:$0xff]  }
 0x458   :  { %1280 = vst [vmem:[%s3399_s5 + $0x3b] sm:$0x1] %v1264_v27  ;;  %v3207_v8 = vld [vmem:[#allocation6 + $0x4c] ss:$12 sps:$4 sm:$0xff]   ;;  %v3211_v26 = vld [vmem:[#allocation6 + $0x48] ss:$12 sps:$4 sm:$0xff]  }
 0x459   :  { %1462 = vmatpush1.bf16.msra.mxu0 %v2638_v32  ;;  %v3214_v34 = vld [vmem:[#allocation6 + $0x50] ss:$12 sps:$4 sm:$0xff]   ;;  %v3217_v56 = vld [vmem:[#allocation6 + $0x34] ss:$12 sps:$4 sm:$0xff]  }
 0x45a   :  { %2290 = vmatpush3.bf16.msra.mxu1 %v2667_v42  ;;  %1463 = vmatprep.subr.bf16.mxu0 %v2641_v33  ;;  %v3221_v27 = vld [vmem:[#allocation6 + $0x30] ss:$12 sps:$4 sm:$0xff]  }
 0x45b   :  { %2291 = vmatprep.subr.bf16.mxu1 %v3409_v61 }
 0x45d   :  { %1464 = vmatpush1.bf16.msra.mxu0 %v2647_v36 }
 0x45e   :  { %2292 = vmatpush3.bf16.msra.mxu1 %v2681_v46  ;;  %1465 = vmatprep.subr.bf16.mxu0 %v2654_v38 }
 0x45f   :  { %2293 = vmatprep.subr.bf16.mxu1 %v3409_v61 }
 0x461   :  { %1466 = vmatpush1.bf16.msra.mxu0 %v2661_v40 }
 0x462   :  { %2294 = vmatpush3.bf16.msra.mxu1 %v2693_v49  ;;  %1467 = vmatprep.subr.bf16.mxu0 %v2664_v41 }
 0x463   :  { %2295 = vmatprep.subr.bf16.mxu1 %v3409_v61 }
 0x465   :  { %1468 = vmatpush1.bf16.msra.mxu0 %v2674_v44 }
 0x466   :  { %2296 = vmatpush3.bf16.msra.mxu1 %v2702_v51  ;;  %1469 = vmatprep.subr.bf16.mxu0 %v2678_v45 }
 0x467   :  { %2297 = vmatprep.subr.bf16.mxu1 %v3409_v61 }
 0x469   :  { %1470 = vmatpush1.bf16.msra.mxu0 %v2687_v47 }
 0x46a   :  { %2298 = vmatpush3.bf16.msra.mxu1 %v2708_v52  ;;  %1471 = vmatprep.subr.bf16.mxu0 %v2690_v48 }
 0x46b   :  { %2299 = vmatprep.subr.bf16.mxu1 %v3409_v61 }
 0x46d   :  { %1472 = vmatpush1.bf16.msra.mxu0 %v2697_v50 }
 0x46e   :  { %2300 = vmatpush3.bf16.msra.mxu1 %v2715_v54  ;;  %1629 = vmatprep.subr.bf16.mxu0 %v3122_v29 }
 0x46f   :  { %2305 = vmatprep.subr.bf16.mxu1 %v3409_v61 }
 0x510   :  { %v1319_v30 = vpop.f32.mrf.mxu0 }
 0x511   :  { %v1360_v32 = vpop.f32.mrf.mxu1  ;;  %v1366_v33 = vadd.f32 %v1319_v30, %v2780_v22  ;;  %v3224_v30 = vld [vmem:[#allocation6 + $0x38] ss:$12 sps:$4 sm:$0xff]  }
 0x512   :  { %v1321_v36 = vpop.f32.mrf.mxu0  ;;  %v1380_v50 = vadd.f32 %v2814_v59, %v1360_v32  ;;  %v3227_v32 = vld [vmem:[#allocation6 + $0x1c] ss:$12 sps:$4 sm:$0xff]  }
 0x513   :  { %v2283_v38 = vpop.f32.mrf.mxu1  ;;  %v2053_v39 = vmul.f32 -1.442695, %v1366_v33  ;;  %v1373_v45 = vadd.f32 %v1321_v36, %v2785_v31  ;;  %v3231_v33 = vld [vmem:[#allocation6 + $0x18] ss:$12 sps:$4 sm:$0xff]   ;;  %v3234_v36 = vld [vmem:[#allocation6 + $0x20] ss:$12 sps:$4 sm:$0xff]  }
 0x514   :  { %v1323_v40 = vpop.f32.mrf.mxu0  ;;  %v3237_v38 = vld [vmem:[#allocation6 + $0x4] ss:$12 sps:$4 sm:$0xff]  }
 0x515   :  { %v1363_v41 = vpop.f32.mrf.mxu1  ;;  %2462 = vpow2.f32 %v2053_v39  ;;  %v2054_v46 = vmul.f32 -1.442695, %v1373_v45  ;;  %v3241_v39 = vld [vmem:[#allocation6] ss:$12 sps:$4 sm:$0xff]   ;;  %v3244_v40 = vld [vmem:[#allocation6 + $0x8] ss:$12 sps:$4 sm:$0xff]  }
 0x516   :  { %v1324_v42 = vpop.f32.mrf.mxu0 }
 0x517   :  { %v2284_v44 = vpop.f32.mrf.mxu1  ;;  %2464 = vpow2.f32 %v2054_v46 }
 0x522   :  { %v2463_v47 = vpop.eup %2462 }
 0x523   :  { %v1370_v48 = vadd.f32 1.0, %v2463_v47 }
 0x524   :  { %v2465_v49 = vpop.eup %2464 }
 0x525   :  { %2466 = vrcp.f32 %v1370_v48  ;;  %v1377_v22 = vadd.f32 1.0, %v2465_v49 }
 0x532   :  { %v2467_v51 = vpop.eup %2466 }
 0x533   :  { %v1381_v52 = vmul.f32 %v2467_v51, %v1380_v50 }
 0x535   :  { %v1382_v54 = vadd.f32 %v1381_v52, %v2793_v57 }
 0x537   :  { %2468 = vtanh.f32 %v1382_v54 }
 0x538   :  { %2470 = vrcp.f32 %v1377_v22 }
 0x544   :  { %v2469_v0 = vpop.eup %2468 }
 0x545   :  { %v1384_v62 = vsub.f32 %v3052_v20, %v2469_v0  ;;  %v2471_v21 = vpop.eup %2470 }
 0x547   :  { %v1385_v31 = vmul.f32 %v2471_v21, %v1384_v62 }
 0x549   :  { %v3131_v2 = vadd.f32 %v2469_v0, %v1385_v31 }
 0x54b   :  { %v1388_v11 = vcombine.high %v3131_v2, %v3131_v2  ;;  %v1395_v1 = vrot.slane %v3131_v2, %v2819_v58  ;;  %v1456_v3 = vpack.c.bf16 %v3131_v2, %v3131_v2 }
 0x54d   :  { %v1402_v57 = vrot.slane %v1388_v11, %v2819_v58  ;;  %v1403_v9 = vcombine.high %v1395_v1, %v1395_v1  ;;  %v1411_v24 = vrot.slane %v1395_v1, %v2819_v58  ;;  %2055 = vst.sshfl [vmem:[%s3399_s5 + $0x4] sm:$0x1 pattern:$0x73625140] %v1395_v1  ;;  %1490 = vmatmul.mubr.bf16.vlgmr.msra.gmra.mxu0 %v1456_v3 }
 0x54e   :  { %2302 = vmatmul.mubr.bf16.vlgmr.msra.gmra.mxu1 %v1456_v3  ;;  %1630 = vmatpush1.bf16.msra.mxu0 %v3144_v12 }
 0x54f   :  { %2306 = vmatpush3.bf16.msra.mxu1 %v3147_v16  ;;  %v1404_v15 = vcombine.high %v1402_v57, %v1402_v57  ;;  %v1418_v25 = vrot.slane %v1402_v57, %v2819_v58  ;;  %v1425_v43 = vrot.slane %v1403_v9, %v2819_v58  ;;  %v1433_v53 = vcombine.high %v1411_v24, %v1411_v24 }
 0x550   :  { %2056 = vst.sshfl [vmem:[%s3399_s5 + $0xc] sm:$0x1 pattern:$0x73625140] %v1403_v9  ;;  %1631 = vmatprep.subr.bf16.mxu0 %v3158_v5  ;;  %2307 = vmatprep.subr.bf16.mxu1 %v3409_v61 }
 0x551   :  { %2057 = vst.sshfl [vmem:[%s3399_s5 + $0x24] sm:$0x1 pattern:$0x73625140] %v1402_v57  ;;  %1661 = vmatprep.mubr.bf16.mxu0 %v3410_v35  ;;  %v1432_v6 = vrot.slane %v1404_v15, %v2819_v58  ;;  %v1434_v18 = vcombine.high %v1418_v25, %v1418_v25  ;;  %v1435_v20 = vcombine.high %v1425_v43, %v1425_v43  ;;  %1447 = vst [vmem:[%s3399_s5 + $0x14] sm:$0x1] %v1433_v53 }
 0x552   :  { %2058 = vst.sshfl [vmem:[%s3399_s5 + $0x2c] sm:$0x1 pattern:$0x73625140] %v1404_v15  ;;  %2321 = vmatprep.mubr.msk.bf16.mxu1 %vm2577_vm0, %v3409_v61  ;;  %1632 = vmatpush1.bf16.msra.mxu0 %v3172_v14 }
 0x553   :  { %2308 = vmatpush3.bf16.msra.mxu1 %v3175_v23  ;;  %v1436_v4 = vcombine.high %v1432_v6, %v1432_v6  ;;  %1448 = vst [vmem:[%s3399_s5 + $0x1c] sm:$0x1] %v1435_v20  ;;  %1451 = vst [vmem:[%s3399_s5 + $0x34] sm:$0x1] %v1434_v18  ;;  %1633 = vmatprep.subr.bf16.mxu0 %v3184_v19 }
 0x554   :  { %2309 = vmatprep.subr.bf16.mxu1 %v3409_v61 }
 0x555   :  { %1452 = vst [vmem:[%s3399_s5 + $0x3c] sm:$0x1] %v1436_v4 }
 0x556   :  { %1634 = vmatpush1.bf16.msra.mxu0 %v3191_v7 }
 0x557   :  { %2310 = vmatpush3.bf16.msra.mxu1 %v3194_v60  ;;  %1635 = vmatprep.subr.bf16.mxu0 %v3197_v37 }
 0x558   :  { %2311 = vmatprep.subr.bf16.mxu1 %v3409_v61 }
 0x55a   :  { %1636 = vmatpush1.bf16.msra.mxu0 %v3201_v13 }
 0x55b   :  { %2312 = vmatpush3.bf16.msra.mxu1 %v3204_v17  ;;  %1637 = vmatprep.subr.bf16.mxu0 %v3207_v8 }
 0x55c   :  { %2313 = vmatprep.subr.bf16.mxu1 %v3409_v61 }
 0x55e   :  { %1638 = vmatpush1.bf16.msra.mxu0 %v3211_v26 }
 0x55f   :  { %2314 = vmatpush3.bf16.msra.mxu1 %v3214_v34  ;;  %1639 = vmatprep.subr.bf16.mxu0 %v3217_v56 }
 0x560   :  { %2315 = vmatprep.subr.bf16.mxu1 %v3409_v61 }
 0x562   :  { %1640 = vmatpush1.bf16.msra.mxu0 %v3221_v27 }
 0x563   :  { %2316 = vmatpush3.bf16.msra.mxu1 %v3224_v30  ;;  %1641 = vmatprep.subr.bf16.mxu0 %v3227_v32 }
 0x564   :  { %2317 = vmatprep.subr.bf16.mxu1 %v3409_v61 }
 0x566   :  { %1642 = vmatpush1.bf16.msra.mxu0 %v3231_v33 }
 0x567   :  { %2318 = vmatpush3.bf16.msra.mxu1 %v3234_v36  ;;  %1643 = vmatprep.subr.bf16.mxu0 %v3237_v38 }
 0x568   :  { %2319 = vmatprep.subr.bf16.mxu1 %v3409_v61 }
 0x56a   :  { %1644 = vmatpush1.bf16.msra.mxu0 %v3241_v39 }
 0x56b   :  { %2320 = vmatpush3.bf16.msra.mxu1 %v3244_v40  ;;  %1801 = vmatprep.subr.bf16.mxu0 %v3122_v29 }
 0x56c   :  { %2325 = vmatprep.subr.bf16.mxu1 %v3409_v61 }
 0x60d   :  { %v1491_v41 = vpop.f32.mrf.mxu0 }
 0x60e   :  { %v1532_v42 = vpop.f32.mrf.mxu1  ;;  %v1538_v44 = vadd.f32 %v1491_v41, %v2790_v55 }
 0x60f   :  { %v1493_v45 = vpop.f32.mrf.mxu0  ;;  %v1552_v62 = vadd.f32 %v2814_v59, %v1532_v42 }
 0x610   :  { %v2303_v46 = vpop.f32.mrf.mxu1  ;;  %v2059_v47 = vmul.f32 -1.442695, %v1538_v44  ;;  %v1545_v52 = vadd.f32 %v1493_v45, %v2795_v63 }
 0x611   :  { %v1495_v48 = vpop.f32.mrf.mxu0 }
 0x612   :  { %v1535_v49 = vpop.f32.mrf.mxu1  ;;  %2472 = vpow2.f32 %v2059_v47  ;;  %v2060_v54 = vmul.f32 -1.442695, %v1545_v52 }
 0x613   :  { %v1496_v50 = vpop.f32.mrf.mxu0 }
 0x614   :  { %v2304_v51 = vpop.f32.mrf.mxu1  ;;  %2474 = vpow2.f32 %v2060_v54 }
 0x61f   :  { %v2473_v22 = vpop.eup %2472 }
 0x620   :  { %v1542_v0 = vadd.f32 1.0, %v2473_v22 }
 0x621   :  { %v2475_v29 = vpop.eup %2474 }
 0x622   :  { %2476 = vrcp.f32 %v1542_v0  ;;  %v1549_v11 = vadd.f32 1.0, %v2475_v29 }
 0x62f   :  { %v2477_v21 = vpop.eup %2476 }
 0x630   :  { %v1553_v55 = vmul.f32 %v2477_v21, %v1552_v62 }
 0x632   :  { %v1554_v31 = vadd.f32 %v1553_v55, %v2803_v10 }
 0x634   :  { %2478 = vtanh.f32 %v1554_v31 }
 0x635   :  { %2480 = vrcp.f32 %v1549_v11 }
 0x641   :  { %v2479_v1 = vpop.eup %2478 }
 0x642   :  { %v1556_v3 = vsub.f32 %v3131_v2, %v2479_v1  ;;  %v2481_v57 = vpop.eup %2480 }
 0x644   :  { %v1557_v63 = vmul.f32 %v2481_v57, %v1556_v3  ;;  %v3414_v57 = vld [vmem:[#allocation14_spill] sm:$0xff] }
 0x646   :  { %v3254_v9 = vadd.f32 %v2479_v1, %v1557_v63 }
 0x648   :  { %v1560_v24 = vcombine.high %v3254_v9, %v3254_v9  ;;  %v1567_v59 = vrot.slane %v3254_v9, %v2819_v58  ;;  %v1628_v15 = vpack.c.bf16 %v3254_v9, %v3254_v9 }
 0x64a   :  { %v1574_v10 = vrot.slane %v1560_v24, %v2819_v58  ;;  %v1575_v25 = vcombine.high %v1567_v59, %v1567_v59  ;;  %v1583_v43 = vrot.slane %v1567_v59, %v2819_v58  ;;  %2061 = vst.sshfl [vmem:[%s3399_s5 + $0x5] sm:$0x1 pattern:$0x73625140] %v1567_v59  ;;  %1662 = vmatmul.mubr.bf16.vlgmr.msra.gmra.mxu0 %v1628_v15 }
 0x64b   :  { %2322 = vmatmul.mubr.bf16.vlgmr.msra.gmra.mxu1 %v1628_v15  ;;  %1802 = vmatpush1.bf16.msra.mxu0 %v3144_v12 }
 0x64c   :  { %2326 = vmatpush3.bf16.msra.mxu1 %v3147_v16  ;;  %v1576_v2 = vcombine.high %v1574_v10, %v1574_v10  ;;  %v1590_v53 = vrot.slane %v1574_v10, %v2819_v58  ;;  %v1597_v6 = vrot.slane %v1575_v25, %v2819_v58  ;;  %v1605_v18 = vcombine.high %v1583_v43, %v1583_v43 }
 0x64d   :  { %2062 = vst.sshfl [vmem:[%s3399_s5 + $0xd] sm:$0x1 pattern:$0x73625140] %v1575_v25  ;;  %1803 = vmatprep.subr.bf16.mxu0 %v3158_v5  ;;  %2327 = vmatprep.subr.bf16.mxu1 %v3409_v61 }
 0x64e   :  { %2063 = vst.sshfl [vmem:[%s3399_s5 + $0x25] sm:$0x1 pattern:$0x73625140] %v1574_v10  ;;  %1833 = vmatprep.mubr.bf16.mxu0 %v3410_v35  ;;  %v1604_v12 = vrot.slane %v1576_v2, %v2819_v58  ;;  %v1606_v16 = vcombine.high %v1590_v53, %v1590_v53  ;;  %v1607_v20 = vcombine.high %v1597_v6, %v1597_v6  ;;  %1619 = vst [vmem:[%s3399_s5 + $0x15] sm:$0x1] %v1605_v18 }
 0x64f   :  { %2064 = vst.sshfl [vmem:[%s3399_s5 + $0x2d] sm:$0x1 pattern:$0x73625140] %v1576_v2  ;;  %2341 = vmatprep.mubr.msk.bf16.mxu1 %vm2577_vm0, %v3409_v61  ;;  %1804 = vmatpush1.bf16.msra.mxu0 %v3172_v14 }
 0x650   :  { %2328 = vmatpush3.bf16.msra.mxu1 %v3175_v23  ;;  %v1608_v35 = vcombine.high %v1604_v12, %v1604_v12  ;;  %1620 = vst [vmem:[%s3399_s5 + $0x1d] sm:$0x1] %v1607_v20  ;;  %1623 = vst [vmem:[%s3399_s5 + $0x35] sm:$0x1] %v1606_v16  ;;  %1805 = vmatprep.subr.bf16.mxu0 %v3184_v19  ;;  %v3411_v23 = vld [vmem:[#allocation12_spill] sm:$0xff] }
 0x651   :  { %2329 = vmatprep.subr.bf16.mxu1 %v3409_v61 }
 0x652   :  { %1624 = vst [vmem:[%s3399_s5 + $0x3d] sm:$0x1] %v1608_v35 }
 0x653   :  { %1806 = vmatpush1.bf16.msra.mxu0 %v3191_v7 }
 0x654   :  { %2330 = vmatpush3.bf16.msra.mxu1 %v3194_v60  ;;  %1807 = vmatprep.subr.bf16.mxu0 %v3197_v37 }
 0x655   :  { %2331 = vmatprep.subr.bf16.mxu1 %v3409_v61 }
 0x657   :  { %1808 = vmatpush1.bf16.msra.mxu0 %v3201_v13 }
 0x658   :  { %2332 = vmatpush3.bf16.msra.mxu1 %v3204_v17  ;;  %1809 = vmatprep.subr.bf16.mxu0 %v3207_v8 }
 0x659   :  { %2333 = vmatprep.subr.bf16.mxu1 %v3409_v61 }
 0x65b   :  { %1810 = vmatpush1.bf16.msra.mxu0 %v3211_v26  ;;  %v3412_v26 = vld [vmem:[#allocation13_spill] sm:$0xff] }
 0x65c   :  { %2334 = vmatpush3.bf16.msra.mxu1 %v3214_v34  ;;  %1811 = vmatprep.subr.bf16.mxu0 %v3217_v56 }
 0x65d   :  { %2335 = vmatprep.subr.bf16.mxu1 %v3409_v61 }
 0x65f   :  { %1812 = vmatpush1.bf16.msra.mxu0 %v3221_v27 }
 0x660   :  { %2336 = vmatpush3.bf16.msra.mxu1 %v3224_v30  ;;  %1813 = vmatprep.subr.bf16.mxu0 %v3227_v32  ;;  %v2526_v32 = vld [vmem:[%s3398_s4] ss:$0 sm:$0xff] }
 0x661   :  { %2337 = vmatprep.subr.bf16.mxu1 %v3409_v61 }
 0x663   :  { %1814 = vmatpush1.bf16.msra.mxu0 %v3231_v33 }
 0x664   :  { %2338 = vmatpush3.bf16.msra.mxu1 %v3234_v36  ;;  %1815 = vmatprep.subr.bf16.mxu0 %v3237_v38 }
 0x665   :  { %2339 = vmatprep.subr.bf16.mxu1 %v3409_v61 }
 0x667   :  { %1816 = vmatpush1.bf16.msra.mxu0 %v3241_v39  ;;  %v3413_v39 = vld [vmem:[#allocation10_spill] sm:$0xff] }
 0x668   :  { %2340 = vmatpush3.bf16.msra.mxu1 %v3244_v40 }
 0x70a   :  { %v1663_v5 = vpop.f32.mrf.mxu0 }
 0x70b   :  { %v1704_v14 = vpop.f32.mrf.mxu1  ;;  %v1710_v4 = vadd.f32 %v1663_v5, %v3411_v23  ;;  %v3415_v5 = vld [vmem:[#allocation11_spill] sm:$0xff] }
 0x70c   :  { %v1665_v19 = vpop.f32.mrf.mxu0  ;;  %v1724_v33 = vadd.f32 %v2526_v32, %v1704_v14 }
 0x70d   :  { %v2323_v7 = vpop.f32.mrf.mxu1  ;;  %v2065_v60 = vmul.f32 -1.442695, %v1710_v4  ;;  %v1717_v34 = vadd.f32 %v1665_v19, %v3412_v26 }
 0x70e   :  { %v1667_v37 = vpop.f32.mrf.mxu0 }
 0x70f   :  { %v1707_v13 = vpop.f32.mrf.mxu1  ;;  %2482 = vpow2.f32 %v2065_v60  ;;  %v2066_v56 = vmul.f32 -1.442695, %v1717_v34 }
 0x710   :  { %v1668_v17 = vpop.f32.mrf.mxu0 }
 0x711   :  { %v2324_v8 = vpop.f32.mrf.mxu1  ;;  %2484 = vpow2.f32 %v2066_v56 }
 0x71c   :  { %v2483_v61 = vpop.eup %2482 }
 0x71d   :  { %v1714_v27 = vadd.f32 1.0, %v2483_v61 }
 0x71e   :  { %v2485_v30 = vpop.eup %2484 }
 0x71f   :  { %2486 = vrcp.f32 %v1714_v27  ;;  %v1721_v41 = vadd.f32 1.0, %v2485_v30 }
 0x72c   :  { %v2487_v36 = vpop.eup %2486 }
 0x72d   :  { %v1725_v38 = vmul.f32 %v2487_v36, %v1724_v33 }
 0x72f   :  { %v1726_v40 = vadd.f32 %v1725_v38, %v3413_v39 }
 0x731   :  { %2488 = vtanh.f32 %v1726_v40 }
 0x732   :  { %2490 = vrcp.f32 %v1721_v41 }
 0x73e   :  { %v2489_v42 = vpop.eup %2488 }
 0x73f   :  { %v1728_v44 = vsub.f32 %v3254_v9, %v2489_v42  ;;  %v2491_v45 = vpop.eup %2490 }
 0x741   :  { %v1729_v46 = vmul.f32 %v2491_v45, %v1728_v44 }
 0x743   :  { %v1730_v47 = vadd.f32 %v2489_v42, %v1729_v46 }
 0x745   :  { %v1732_v48 = vcombine.high %v1730_v47, %v1730_v47  ;;  %v1739_v49 = vrot.slane %v1730_v47, %v2819_v58  ;;  %v1800_v50 = vpack.c.bf16 %v1730_v47, %v1730_v47 }
 0x747   :  { %v1746_v51 = vrot.slane %v1732_v48, %v2819_v58  ;;  %v1747_v52 = vcombine.high %v1739_v49, %v1739_v49  ;;  %v1755_v54 = vrot.slane %v1739_v49, %v2819_v58  ;;  %2067 = vst.sshfl [vmem:[%s3399_s5 + $0x6] sm:$0x1 pattern:$0x73625140] %v1739_v49  ;;  %1834 = vmatmul.mubr.bf16.vlgmr.msra.gmra.mxu0 %v1800_v50 }
 0x748   :  { %2342 = vmatmul.mubr.bf16.vlgmr.msra.gmra.mxu1 %v1800_v50 }
 0x749   :  { %v1748_v22 = vcombine.high %v1746_v51, %v1746_v51  ;;  %v1762_v0 = vrot.slane %v1746_v51, %v2819_v58  ;;  %v1769_v29 = vrot.slane %v1747_v52, %v2819_v58  ;;  %v1777_v62 = vcombine.high %v1755_v54, %v1755_v54  ;;  %2068 = vst.sshfl [vmem:[%s3399_s5 + $0xe] sm:$0x1 pattern:$0x73625140] %v1747_v52 }
 0x74a   :  { %2069 = vst.sshfl [vmem:[%s3399_s5 + $0x26] sm:$0x1 pattern:$0x73625140] %v1746_v51 }
 0x74b   :  { %v1776_v21 = vrot.slane %v1748_v22, %v2819_v58  ;;  %v1778_v55 = vcombine.high %v1762_v0, %v1762_v0  ;;  %v1779_v31 = vcombine.high %v1769_v29, %v1769_v29  ;;  %1791 = vst [vmem:[%s3399_s5 + $0x16] sm:$0x1] %v1777_v62  ;;  %2070 = vst.sshfl [vmem:[%s3399_s5 + $0x2e] sm:$0x1 pattern:$0x73625140] %v1748_v22 }
 0x74d   :  { %v1780_v11 = vcombine.high %v1776_v21, %v1776_v21  ;;  %1792 = vst [vmem:[%s3399_s5 + $0x1e] sm:$0x1] %v1779_v31  ;;  %1795 = vst [vmem:[%s3399_s5 + $0x36] sm:$0x1] %v1778_v55 }
 0x74f   :  { %1796 = vst [vmem:[%s3399_s5 + $0x3e] sm:$0x1] %v1780_v11 }
 0x807   :  { %v1835_v1 = vpop.f32.mrf.mxu0 }
 0x808   :  { %v1876_v3 = vpop.f32.mrf.mxu1  ;;  %v1882_v63 = vadd.f32 %v1835_v1, %v3414_v57 }
 0x809   :  { %v1837_v9 = vpop.f32.mrf.mxu0  ;;  %v1896_v16 = vadd.f32 %v2526_v32, %v1876_v3 }
 0x80a   :  { %v2343_v24 = vpop.f32.mrf.mxu1  ;;  %v2071_v59 = vmul.f32 -1.442695, %v1882_v63  ;;  %v1889_v2 = vadd.f32 %v1837_v9, %v2809_v28 }
 0x80b   :  { %v1839_v15 = vpop.f32.mrf.mxu0 }
 0x80c   :  { %v1879_v10 = vpop.f32.mrf.mxu1  ;;  %2492 = vpow2.f32 %v2071_v59  ;;  %v2072_v53 = vmul.f32 -1.442695, %v1889_v2 }
 0x80d   :  { %v1840_v25 = vpop.f32.mrf.mxu0 }
 0x80e   :  { %v2344_v43 = vpop.f32.mrf.mxu1  ;;  %2494 = vpow2.f32 %v2072_v53 }
 0x819   :  { %v2493_v6 = vpop.eup %2492 }
 0x81a   :  { %v1886_v18 = vadd.f32 1.0, %v2493_v6 }
 0x81b   :  { %v2495_v12 = vpop.eup %2494 }
 0x81c   :  { %2496 = vrcp.f32 %v1886_v18  ;;  %v1893_v23 = vadd.f32 1.0, %v2495_v12 }
 0x829   :  { %v2497_v20 = vpop.eup %2496 }
 0x82a   :  { %v1897_v35 = vmul.f32 %v2497_v20, %v1896_v16 }
 0x82c   :  { %v1898_v14 = vadd.f32 %v1897_v35, %v3415_v5 }
 0x82e   :  { %2498 = vtanh.f32 %v1898_v14 }
 0x82f   :  { %2500 = vrcp.f32 %v1893_v23 }
 0x83b   :  { %v2499_v4 = vpop.eup %2498 }
 0x83c   :  { %v1900_v19 = vsub.f32 %v1730_v47, %v2499_v4  ;;  %v2501_v7 = vpop.eup %2500 }
 0x83e   :  { %v1901_v60 = vmul.f32 %v2501_v7, %v1900_v19 }
 0x840   :  { %v1902_v37 = vadd.f32 %v2499_v4, %v1901_v60 }
 0x842   :  { %v1904_v28 = vcombine.high %v1902_v37, %v1902_v37  ;;  %v1911_v13 = vrot.slane %v1902_v37, %v2819_v58 }
 0x844   :  { %v1918_v17 = vrot.slane %v1904_v28, %v2819_v58  ;;  %v1919_v8 = vcombine.high %v1911_v13, %v1911_v13  ;;  %v1927_v26 = vrot.slane %v1911_v13, %v2819_v58  ;;  %2073 = vst.sshfl [vmem:[%s3399_s5 + $0x7] sm:$0x1 pattern:$0x73625140] %v1911_v13 }
 0x846   :  { %v1920_v34 = vcombine.high %v1918_v17, %v1918_v17  ;;  %v1934_v56 = vrot.slane %v1918_v17, %v2819_v58  ;;  %v1941_v61 = vrot.slane %v1919_v8, %v2819_v58  ;;  %v1949_v27 = vcombine.high %v1927_v26, %v1927_v26  ;;  %2074 = vst.sshfl [vmem:[%s3399_s5 + $0xf] sm:$0x1 pattern:$0x73625140] %v1919_v8 }
 0x847   :  { %2075 = vst.sshfl [vmem:[%s3399_s5 + $0x27] sm:$0x1 pattern:$0x73625140] %v1918_v17 }
 0x848   :  { %v1948_v30 = vrot.slane %v1920_v34, %v2819_v58  ;;  %v1950_v32 = vcombine.high %v1934_v56, %v1934_v56  ;;  %v1951_v33 = vcombine.high %v1941_v61, %v1941_v61  ;;  %1963 = vst [vmem:[%s3399_s5 + $0x17] sm:$0x1] %v1949_v27  ;;  %2076 = vst.sshfl [vmem:[%s3399_s5 + $0x2f] sm:$0x1 pattern:$0x73625140] %v1920_v34 }
 0x84a   :  { %v1952_v36 = vcombine.high %v1948_v30, %v1948_v30  ;;  %1964 = vst [vmem:[%s3399_s5 + $0x1f] sm:$0x1] %v1951_v33  ;;  %1967 = vst [vmem:[%s3399_s5 + $0x37] sm:$0x1] %v1950_v32 }
 0x84c   :  { %1968 = vst [vmem:[%s3399_s5 + $0x3f] sm:$0x1] %v1952_v36 }
 0x84d   :  { %1974 = vsyncpa [#allocation5], 1 }
 0x84e   :  { %1975 = vsyncpa [#allocation7], 1 }

</bundles_post_ra>
